<compile_context>
chip_gen: v7x
topology: tpu7x:2x2x1
jax: 0.10.0
libtpu: 0.0.40
codegen_flags: <defaults>
</compile_context>

<pallas_src>
import functools

import jax
import jax.numpy as jnp
from jax import lax
from jax.experimental import pallas as pl
from jax.experimental.pallas import tpu as pltpu

LANE = 128


def _round_up(x, m):
    return ((x + m - 1) // m) * m


# ----------------------------------------------------------------------------
# Kernel 1: fused 3x3 stride-1 conv + folded-BN affine + optional residual
#           + optional ReLU.  im2col happens in VMEM (9 shifted slices of the
#           halo-padded image), weights stay VMEM-resident across the grid.
# ----------------------------------------------------------------------------
def _conv3x3_s1_kernel(x_ref, w_ref, scale_ref, bias_ref, *rest,
                       apply_relu, has_residual):
    if has_residual:
        res_ref, o_ref = rest
    else:
        res_ref = None
        (o_ref,) = rest
    _, Ho, Wo, cout = o_ref.shape
    cin = x_ref.shape[-1]

    acc = jnp.zeros((Ho * Wo, cout), jnp.float32)
    for t in range(9):                       # 9 taps, unrolled at trace time
        dy, dx = t // 3, t % 3
        patch = x_ref[0, dy:dy + Ho, dx:dx + Wo, :].reshape(Ho * Wo, cin)
        acc = acc + jnp.dot(patch, w_ref[t],
                            preferred_element_type=jnp.float32)

    y = acc * scale_ref[...] + bias_ref[...]
    if has_residual:
        y = y + res_ref[0].reshape(Ho * Wo, cout).astype(jnp.float32)
    if apply_relu:
        y = jnp.maximum(y, 0.0)
    o_ref[0] = y.reshape(Ho, Wo, cout).astype(o_ref.dtype)


def conv3x3_s1_bn_act(x_nhwc, w_taps, scale, bias, res=None, *, apply_relu):
    """Fused 3x3/stride-1/pad-1 conv + BN (+ residual) (+ ReLU).

    x_nhwc: [N,H,W,Cp] bf16 (channels pre-padded to 128 mult)
    w_taps: [9, Cp, Coutp] bf16 (tap order dy*3+dx)
    scale/bias: [Coutp] f32 (folded BN), res: optional [N,H,W,Coutp] bf16
    Returns [N,H,W,Coutp] bf16.
    """
    N, H, W, Cp = x_nhwc.shape
    Coutp = w_taps.shape[-1]
    # 1-pixel zero halo added once in HBM (cheap vs the removed 9x im2col).
    # TODO(synk): handle the halo with in-kernel masking / row-tiling for very
    # large spatial dims instead of a full-image block per batch element.
    xp = jnp.pad(x_nhwc, ((0, 0), (1, 1), (1, 1), (0, 0)))
    s2 = scale.reshape(1, Coutp).astype(jnp.float32)
    b2 = bias.reshape(1, Coutp).astype(jnp.float32)

    in_specs = [
        pl.BlockSpec((1, H + 2, W + 2, Cp), lambda n: (n, 0, 0, 0)),  # image
        pl.BlockSpec((9, Cp, Coutp), lambda n: (0, 0, 0)),            # weights (resident)
        pl.BlockSpec((1, Coutp), lambda n: (0, 0)),                   # bn scale
        pl.BlockSpec((1, Coutp), lambda n: (0, 0)),                   # bn bias
    ]
    args = [xp, w_taps, s2, b2]
    has_residual = res is not None
    if has_residual:
        in_specs.append(pl.BlockSpec((1, H, W, Coutp), lambda n: (n, 0, 0, 0)))
        args.append(res)

    kernel = functools.partial(_conv3x3_s1_kernel,
                               apply_relu=apply_relu,
                               has_residual=has_residual)
    return pl.pallas_call(
        kernel,
        out_shape=jax.ShapeDtypeStruct((N, H, W, Coutp), jnp.bfloat16),
        grid_spec=pltpu.PrefetchScalarGridSpec(
            num_scalar_prefetch=0,
            grid=(N,),
            in_specs=in_specs,
            out_specs=pl.BlockSpec((1, H, W, Coutp), lambda n: (n, 0, 0, 0)),
        ),
        compiler_params=pltpu.CompilerParams(
            dimension_semantics=("parallel",),
            vmem_limit_bytes=48 * 1024 * 1024,
        ),
    )(*args)


# ----------------------------------------------------------------------------
# Kernel 2: tiled matmul + folded-BN affine (+ ReLU).  Used for the strided
#           conv1 (wrapper im2col) and the 1x1 projection shortcut.
#           Weight is kept fully VMEM-resident whenever it fits (always true
#           for BasicBlock sizes) => single K step, no accumulator scratch.
# ----------------------------------------------------------------------------
def _matmul_bn_single_k(a_ref, w_ref, scale_ref, bias_ref, o_ref, *, apply_relu):
    acc = jnp.dot(a_ref[...], w_ref[...], preferred_element_type=jnp.float32)
    y = acc * scale_ref[...] + bias_ref[...]
    if apply_relu:
        y = jnp.maximum(y, 0.0)
    o_ref[...] = y.astype(o_ref.dtype)


def _matmul_bn_multi_k(a_ref, w_ref, scale_ref, bias_ref, o_ref, acc_ref, *,
                       apply_relu):
    @pl.when(pl.program_id(2) == 0)
    def _():
        acc_ref[...] = jnp.zeros_like(acc_ref)

    acc_ref[...] += jnp.dot(a_ref[...], w_ref[...],
                            preferred_element_type=jnp.float32)

    @pl.when(pl.program_id(2) == pl.num_programs(2) - 1)
    def _():
        y = acc_ref[...] * scale_ref[...] + bias_ref[...]
        if apply_relu:
            y = jnp.maximum(y, 0.0)
        o_ref[...] = y.astype(o_ref.dtype)


def matmul_bn(a, w, scale, bias, *, apply_relu):
    """y = maybe_relu((a @ w) * scale + bias).

    a: [M,K] bf16, w: [K,Coutp] bf16 with K, Coutp multiples of 128 (caller
    pre-pads channels, so no post-hoc padding of the big A matrix is needed).
    Returns [M, Coutp] bf16.
    """
    M, K = a.shape
    Kw, coutp = w.shape
    assert K == Kw and K % LANE == 0 and coutp % LANE == 0

    # Biggest M tile that fits, but keep >= 2 parallel tiles (v7x has 2 TCs).
    TM = min(1024, _round_up(M, 8))
    if _round_up(M, TM) == TM and M > 8:
        TM = _round_up((M + 1) // 2, 8)
    Mp = _round_up(M, TM)

    # Full-Cout tile for standard ResNet channel counts (no redundant A reads).
    TN = coutp if coutp <= 512 else 512
    while coutp % TN != 0:
        TN -= LANE
    Np = coutp

    a_p = a if Mp == M else jnp.pad(a, ((0, Mp - M), (0, 0)))
    s2 = scale.reshape(1, Np).astype(jnp.float32)
    b2 = bias.reshape(1, Np).astype(jnp.float32)

    w_resident = K * Np * 2 <= 8 * 1024 * 1024   # always true for BasicBlock
    if w_resident:
        grid = (Mp // TM, Np // TN)
        in_specs = [
            pl.BlockSpec((TM, K), lambda i, j: (i, 0)),   # A tile
            pl.BlockSpec((K, TN), lambda i, j: (0, j)),   # W: VMEM-resident
            pl.BlockSpec((1, TN), lambda i, j: (0, j)),   # bn scale
            pl.BlockSpec((1, TN), lambda i, j: (0, j)),   # bn bias
        ]
        out_spec = pl.BlockSpec((TM, TN), lambda i, j: (i, j))
        kernel = functools.partial(_matmul_bn_single_k, apply_relu=apply_relu)
        scratch = []
        dims = ("parallel", "parallel")
    else:  # generic fallback (not hit for BasicBlock shapes)
        TK = 512 if K % 512 == 0 else (256 if K % 256 == 0 else 128)
        grid = (Mp // TM, Np // TN, K // TK)
        in_specs = [
            pl.BlockSpec((TM, TK), lambda i, j, k: (i, k)),
            pl.BlockSpec((TK, TN), lambda i, j, k: (k, j)),
            pl.BlockSpec((1, TN), lambda i, j, k: (0, j)),
            pl.BlockSpec((1, TN), lambda i, j, k: (0, j)),
        ]
        out_spec = pl.BlockSpec((TM, TN), lambda i, j, k: (i, j))
        kernel = functools.partial(_matmul_bn_multi_k, apply_relu=apply_relu)
        scratch = [pltpu.VMEM((TM, TN), jnp.float32)]
        dims = ("parallel", "parallel", "arbitrary")

    out = pl.pallas_call(
        kernel,
        out_shape=jax.ShapeDtypeStruct((Mp, Np), jnp.bfloat16),
        grid_spec=pltpu.PrefetchScalarGridSpec(
            num_scalar_prefetch=0, grid=grid,
            in_specs=in_specs, out_specs=out_spec, scratch_shapes=scratch),
        compiler_params=pltpu.CompilerParams(
            dimension_semantics=dims,
            vmem_limit_bytes=48 * 1024 * 1024),
    )(a_p, w, s2, b2)
    return out[:M] if Mp != M else out


# ----------------------------------------------------------------------------
# JAX glue: channel-padded NHWC plumbing, BN folding, weight repacking
# ----------------------------------------------------------------------------
def im2col_3x3(x_nhwc, stride):
    """x:[N,H,W,Cp] bf16 -> patches [N*Ho*Wo, 9*Cp], column order (dy,dx,c)."""
    N, H, W, Cp = x_nhwc.shape
    xp = jnp.pad(x_nhwc, ((0, 0), (1, 1), (1, 1), (0, 0)))
    Ho = (H - 1) // stride + 1
    Wo = (W - 1) // stride + 1
    cols = []
    for dy in range(3):
        for dx in range(3):
            cols.append(xp[:, dy:dy + (Ho - 1) * stride + 1:stride,
                              dx:dx + (Wo - 1) * stride + 1:stride, :])
    p = jnp.concatenate(cols, axis=-1)
    return p.reshape(N * Ho * Wo, 9 * Cp), Ho, Wo


def bn_fold(gamma, beta, mean, var, coutp, eps=1e-5):
    scale = gamma / jnp.sqrt(var + eps)
    bias = beta - mean * scale
    pad = coutp - gamma.shape[0]
    return (jnp.pad(scale, (0, pad)).astype(jnp.float32),
            jnp.pad(bias, (0, pad)).astype(jnp.float32))


def conv_w_taps(w, cinp, coutp):
    """OIHW [O,I,3,3] -> [9, cinp, coutp] bf16 (tap index dy*3+dx)."""
    O, I, kh, kw = w.shape
    wp = jnp.pad(w, ((0, coutp - O), (0, cinp - I), (0, 0), (0, 0)))
    return wp.transpose(2, 3, 1, 0).reshape(kh * kw, cinp, coutp).astype(jnp.bfloat16)


def conv_w_mat(w, cinp, coutp):
    """OIHW [O,I,kh,kw] -> [kh*kw*cinp, coutp] bf16, row order (dy,dx,c)."""
    O, I, kh, kw = w.shape
    wp = jnp.pad(w, ((0, coutp - O), (0, cinp - I), (0, 0), (0, 0)))
    return wp.transpose(2, 3, 1, 0).reshape(kh * kw * cinp, coutp).astype(jnp.bfloat16)


def basic_block_forward(x, params, stride):
    """BasicBlock forward (eval semantics).  x: [N, Cin, H, W] float32."""
    # TODO(synk): Dropout(p=0.2) is identity in eval mode; training-mode
    # masking is not implemented (matches model.eval()).
    N, Cin, H, W = x.shape
    planes = params["w1"].shape[0]
    Cinp = _round_up(Cin, LANE)
    Pp = _round_up(planes, LANE)

    # Single NCHW->NHWC transpose + channel pad at the block boundary; the
    # whole block stays channel-padded bf16 NHWC until the final crop.
    x_nhwc = jnp.transpose(x, (0, 2, 3, 1)).astype(jnp.bfloat16)
    x_nhwc = jnp.pad(x_nhwc, ((0, 0), (0, 0), (0, 0), (0, Cinp - Cin)))

    # conv1 -> bn1 -> relu
    s1, b1 = bn_fold(params["g1"], params["be1"], params["m1"], params["v1"], Pp)
    if stride == 1:
        out1 = conv3x3_s1_bn_act(x_nhwc, conv_w_taps(params["w1"], Cinp, Pp),
                                 s1, b1, None, apply_relu=True)
        Ho, Wo = H, W
    else:
        # TODO(synk): strided 3x3 conv still uses wrapper-side im2col; an
        # in-kernel strided/halo path would remove the remaining A blow-up.
        a1, Ho, Wo = im2col_3x3(x_nhwc, stride)
        o1 = matmul_bn(a1, conv_w_mat(params["w1"], Cinp, Pp), s1, b1,
                       apply_relu=True)
        out1 = o1.reshape(N, Ho, Wo, Pp)

    # shortcut branch (bf16, channel-padded)
    if stride != 1 or Cin != planes:
        asc = x_nhwc[:, ::stride, ::stride, :].reshape(N * Ho * Wo, Cinp)
        ss, bs = bn_fold(params["gs"], params["bes"], params["ms"], params["vs"], Pp)
        short = matmul_bn(asc, conv_w_mat(params["ws"], Cinp, Pp), ss, bs,
                          apply_relu=False).reshape(N, Ho, Wo, Pp)
    else:
        short = x_nhwc   # Cinp == Pp here

    # conv2 -> bn2 -> (+ shortcut) -> relu, all fused in one kernel
    s2, b2 = bn_fold(params["g2"], params["be2"], params["m2"], params["v2"], Pp)
    out2 = conv3x3_s1_bn_act(out1, conv_w_taps(params["w2"], Pp, Pp), s2, b2,
                             short, apply_relu=True)

    # Crop padded channels once and return NCHW f32 (PyTorch convention).
    return out2[..., :planes].transpose(0, 3, 1, 2).astype(jnp.float32)


# ----------------------------------------------------------------------------
# Pure-JAX reference (bf16-matched conv math, for correctness check)
# ----------------------------------------------------------------------------
def conv2d_ref(x, w, stride, padding):
    return lax.conv_general_dilated(
        x.astype(jnp.bfloat16), w.astype(jnp.bfloat16),
        (stride, stride), [(padding, padding)] * 2,
        dimension_numbers=("NCHW", "OIHW", "NCHW"),
        preferred_element_type=jnp.float32)


def bn_ref(x, gamma, beta, mean, var, eps=1e-5):
    s = (gamma / jnp.sqrt(var + eps)).reshape(1, -1, 1, 1)
    b = (beta - mean * gamma / jnp.sqrt(var + eps)).reshape(1, -1, 1, 1)
    return x * s + b


def basic_block_ref(x, p, stride):
    out = jax.nn.relu(bn_ref(conv2d_ref(x, p["w1"], stride, 1),
                             p["g1"], p["be1"], p["m1"], p["v1"]))
    out = bn_ref(conv2d_ref(out, p["w2"], 1, 1),
                 p["g2"], p["be2"], p["m2"], p["v2"])
    Cin, planes = x.shape[1], p["w1"].shape[0]
    if stride != 1 or Cin != planes:
        sc = bn_ref(conv2d_ref(x, p["ws"], stride, 0),
                    p["gs"], p["bes"], p["ms"], p["vs"])
    else:
        sc = x
    return jax.nn.relu(out + sc)


# ----------------------------------------------------------------------------
# Deterministic parameter init + run
# ----------------------------------------------------------------------------
def init_params(key, in_planes, planes):
    ks = jax.random.split(key, 12)
    p = {
        "w1": 0.1 * jax.random.normal(ks[0], (planes, in_planes, 3, 3), jnp.float32),
        "g1": 1.0 + 0.1 * jax.random.normal(ks[1], (planes,), jnp.float32),
        "be1": 0.1 * jax.random.normal(ks[2], (planes,), jnp.float32),
        "m1": 0.1 * jax.random.normal(ks[3], (planes,), jnp.float32),
        "v1": 1.0 + 0.5 * jax.random.uniform(ks[4], (planes,), jnp.float32),
        "w2": 0.1 * jax.random.normal(ks[5], (planes, planes, 3, 3), jnp.float32),
        "g2": 1.0 + 0.1 * jax.random.normal(ks[6], (planes,), jnp.float32),
        "be2": 0.1 * jax.random.normal(ks[7], (planes,), jnp.float32),
        "m2": 0.1 * jax.random.normal(ks[8], (planes,), jnp.float32),
        "v2": 1.0 + 0.5 * jax.random.uniform(ks[9], (planes,), jnp.float32),
    }
    ks2 = jax.random.split(ks[10], 5)
    p.update({
        "ws": 0.1 * jax.random.normal(ks2[0], (planes, in_planes, 1, 1), jnp.float32),
        "gs": 1.0 + 0.1 * jax.random.normal(ks2[1], (planes,), jnp.float32),
        "bes": 0.1 * jax.random.normal(ks2[2], (planes,), jnp.float32),
        "ms": 0.1 * jax.random.normal(ks2[3], (planes,), jnp.float32),
        "vs": 1.0 + 0.5 * jax.random.uniform(ks2[4], (planes,), jnp.float32),
    })
    return p


if __name__ == "__main__":
    key = jax.random.PRNGKey(0)
    k_x, k_p, k_x2, k_p2 = jax.random.split(key, 4)

    fwd = jax.jit(basic_block_forward, static_argnums=2)

    # Path 1: projection shortcut (stride=2, Cin != planes) — exercises the
    # im2col+matmul kernel (conv1, shortcut) and the fused conv kernel (conv2).
    N, in_planes, H, W = 2, 4, 16, 16
    planes, stride = 8, 2
    x = jax.random.normal(k_x, (N, in_planes, H, W), jnp.float32)
    params = init_params(k_p, in_planes, planes)
    out = jax.block_until_ready(fwd(x, params, stride))
    ref = jax.block_until_ready(basic_block_ref(x, params, stride))
    assert out.shape == ref.shape == (N, planes, H // stride, W // stride)
    assert jnp.allclose(out, ref, atol=2e-2, rtol=2e-2), "projection path mismatch"

    # Path 2: identity shortcut (stride=1, Cin == planes) — both convs run the
    # fused in-VMEM-im2col kernel; conv2 fuses the identity residual + ReLU.
    x2 = jax.random.normal(k_x2, (N, planes, H, W), jnp.float32)
    params2 = init_params(k_p2, planes, planes)
    out2 = jax.block_until_ready(fwd(x2, params2, 1))
    ref2 = jax.block_until_ready(basic_block_ref(x2, params2, 1))
    assert out2.shape == ref2.shape == (N, planes, H, W)
    assert jnp.allclose(out2, ref2, atol=2e-2, rtol=2e-2), "identity path mismatch"

    print("KERNEL_OK")
</pallas_src>

<mosaic_0001>
module attributes {stable_mosaic.version = 11 : i64} {
  func.func @_matmul_bn_single_k(%arg0: i32, %arg1: i32, %arg2: memref<64x1152xbf16, #tpu.memory_space<vmem>>, %arg3: memref<1152x128xbf16, #tpu.memory_space<vmem>>, %arg4: memref<1x128xf32, #tpu.memory_space<vmem>>, %arg5: memref<1x128xf32, #tpu.memory_space<vmem>>, %arg6: memref<64x128xbf16, #tpu.memory_space<vmem>>) attributes {dimension_semantics = [#tpu.dimension_semantics<parallel>, #tpu.dimension_semantics<parallel>], iteration_bounds = array<i64: 2, 1>, scalar_prefetch = 0 : i64, scratch_operands = 0 : i64, tpu.core_type = #tpu.core_type<tc>, window_params = [{transform_indices = @transform_0, window_bounds = array<i64: 64, 1152>}, {transform_indices = @transform_1, window_bounds = array<i64: 1152, 128>}, {transform_indices = @transform_2, window_bounds = array<i64: 1, 128>}, {transform_indices = @transform_3, window_bounds = array<i64: 1, 128>}, {transform_indices = @transform_4, window_bounds = array<i64: 64, 128>}]} {
    %c0 = arith.constant 0 : index
    %c0_0 = arith.constant 0 : index
    %0 = vector.load %arg2[%c0, %c0_0] : memref<64x1152xbf16, #tpu.memory_space<vmem>>, vector<64x1152xbf16>
    %c0_1 = arith.constant 0 : index
    %c0_2 = arith.constant 0 : index
    %1 = vector.load %arg3[%c0_1, %c0_2] : memref<1152x128xbf16, #tpu.memory_space<vmem>>, vector<1152x128xbf16>
    %cst = arith.constant dense<0.000000e+00> : vector<64x128xf32>
    %2 = tpu.matmul %0, %1, %cst {dimension_numbers = #tpu.dot_dimension_numbers<[1], [0], [0], [1], [0, 0, 1, 1], [], []>} : vector<64x1152xbf16>, vector<1152x128xbf16>, vector<64x128xf32> -> vector<64x128xf32>
    %c0_3 = arith.constant 0 : index
    %c0_4 = arith.constant 0 : index
    %3 = vector.load %arg4[%c0_3, %c0_4] : memref<1x128xf32, #tpu.memory_space<vmem>>, vector<1x128xf32>
    %4 = vector.broadcast %3 : vector<1x128xf32> to vector<64x128xf32>
    %5 = arith.mulf %2, %4 : vector<64x128xf32>
    %c0_5 = arith.constant 0 : index
    %c0_6 = arith.constant 0 : index
    %6 = vector.load %arg5[%c0_5, %c0_6] : memref<1x128xf32, #tpu.memory_space<vmem>>, vector<1x128xf32>
    %7 = vector.broadcast %6 : vector<1x128xf32> to vector<64x128xf32>
    %8 = arith.addf %5, %7 : vector<64x128xf32>
    %cst_7 = arith.constant 0.000000e+00 : f32
    %9 = vector.broadcast %cst_7 : f32 to vector<64x128xf32>
    %10 = arith.maximumf %8, %9 : vector<64x128xf32>
    %11 = arith.truncf %10 : vector<64x128xf32> to vector<64x128xbf16>
    %c0_8 = arith.constant 0 : index
    %c0_9 = arith.constant 0 : index
    %12 = vector.load %arg6[%c0_8, %c0_9] : memref<64x128xbf16, #tpu.memory_space<vmem>>, vector<64x128xbf16>
    tpu.vector_store %arg6[%c0_8, %c0_9], %11 {strides = array<i32>} : memref<64x128xbf16, #tpu.memory_space<vmem>>, vector<64x128xbf16>,
    return
  }
  func.func @transform_0(%arg0: i32, %arg1: i32) -> (i32, i32) {
    %c0_i32 = arith.constant 0 : i32
    %c0_i32_0 = arith.constant 0 : i32
    return %arg0, %c0_i32 : i32, i32
  }
  func.func @transform_1(%arg0: i32, %arg1: i32) -> (i32, i32) {
    %c0_i32 = arith.constant 0 : i32
    %c0_i32_0 = arith.constant 0 : i32
    return %c0_i32, %arg1 : i32, i32
  }
  func.func @transform_2(%arg0: i32, %arg1: i32) -> (i32, i32) {
    %c0_i32 = arith.constant 0 : i32
    %c0_i32_0 = arith.constant 0 : i32
    return %c0_i32, %arg1 : i32, i32
  }
  func.func @transform_3(%arg0: i32, %arg1: i32) -> (i32, i32) {
    %c0_i32 = arith.constant 0 : i32
    %c0_i32_0 = arith.constant 0 : i32
    return %c0_i32, %arg1 : i32, i32
  }
  func.func @transform_4(%arg0: i32, %arg1: i32) -> (i32, i32) {
    %c0_i32 = arith.constant 0 : i32
    return %arg0, %arg1 : i32, i32
  }
}

module attributes {stable_mosaic.version = 11 : i64} {
  func.func @_matmul_bn_single_k(%arg0: i32, %arg1: i32, %arg2: memref<64x128xbf16, #tpu.memory_space<vmem>>, %arg3: memref<128x128xbf16, #tpu.memory_space<vmem>>, %arg4: memref<1x128xf32, #tpu.memory_space<vmem>>, %arg5: memref<1x128xf32, #tpu.memory_space<vmem>>, %arg6: memref<64x128xbf16, #tpu.memory_space<vmem>>) attributes {dimension_semantics = [#tpu.dimension_semantics<parallel>, #tpu.dimension_semantics<parallel>], iteration_bounds = array<i64: 2, 1>, scalar_prefetch = 0 : i64, scratch_operands = 0 : i64, tpu.core_type = #tpu.core_type<tc>, window_params = [{transform_indices = @transform_0, window_bounds = array<i64: 64, 128>}, {transform_indices = @transform_1, window_bounds = array<i64: 128, 128>}, {transform_indices = @transform_2, window_bounds = array<i64: 1, 128>}, {transform_indices = @transform_3, window_bounds = array<i64: 1, 128>}, {transform_indices = @transform_4, window_bounds = array<i64: 64, 128>}]} {
    %c0 = arith.constant 0 : index
    %c0_0 = arith.constant 0 : index
    %0 = vector.load %arg2[%c0, %c0_0] : memref<64x128xbf16, #tpu.memory_space<vmem>>, vector<64x128xbf16>
    %c0_1 = arith.constant 0 : index
    %c0_2 = arith.constant 0 : index
    %1 = vector.load %arg3[%c0_1, %c0_2] : memref<128x128xbf16, #tpu.memory_space<vmem>>, vector<128x128xbf16>
    %cst = arith.constant dense<0.000000e+00> : vector<64x128xf32>
    %2 = tpu.matmul %0, %1, %cst {dimension_numbers = #tpu.dot_dimension_numbers<[1], [0], [0], [1], [0, 0, 1, 1], [], []>} : vector<64x128xbf16>, vector<128x128xbf16>, vector<64x128xf32> -> vector<64x128xf32>
    %c0_3 = arith.constant 0 : index
    %c0_4 = arith.constant 0 : index
    %3 = vector.load %arg4[%c0_3, %c0_4] : memref<1x128xf32, #tpu.memory_space<vmem>>, vector<1x128xf32>
    %4 = vector.broadcast %3 : vector<1x128xf32> to vector<64x128xf32>
    %5 = arith.mulf %2, %4 : vector<64x128xf32>
    %c0_5 = arith.constant 0 : index
    %c0_6 = arith.constant 0 : index
    %6 = vector.load %arg5[%c0_5, %c0_6] : memref<1x128xf32, #tpu.memory_space<vmem>>, vector<1x128xf32>
    %7 = vector.broadcast %6 : vector<1x128xf32> to vector<64x128xf32>
    %8 = arith.addf %5, %7 : vector<64x128xf32>
    %9 = arith.truncf %8 : vector<64x128xf32> to vector<64x128xbf16>
    %c0_7 = arith.constant 0 : index
    %c0_8 = arith.constant 0 : index
    %10 = vector.load %arg6[%c0_7, %c0_8] : memref<64x128xbf16, #tpu.memory_space<vmem>>, vector<64x128xbf16>
    tpu.vector_store %arg6[%c0_7, %c0_8], %9 {strides = array<i32>} : memref<64x128xbf16, #tpu.memory_space<vmem>>, vector<64x128xbf16>,
    return
  }
  func.func @transform_0(%arg0: i32, %arg1: i32) -> (i32, i32) {
    %c0_i32 = arith.constant 0 : i32
    %c0_i32_0 = arith.constant 0 : i32
    return %arg0, %c0_i32 : i32, i32
  }
  func.func @transform_1(%arg0: i32, %arg1: i32) -> (i32, i32) {
    %c0_i32 = arith.constant 0 : i32
    %c0_i32_0 = arith.constant 0 : i32
    return %c0_i32, %arg1 : i32, i32
  }
  func.func @transform_2(%arg0: i32, %arg1: i32) -> (i32, i32) {
    %c0_i32 = arith.constant 0 : i32
    %c0_i32_0 = arith.constant 0 : i32
    return %c0_i32, %arg1 : i32, i32
  }
  func.func @transform_3(%arg0: i32, %arg1: i32) -> (i32, i32) {
    %c0_i32 = arith.constant 0 : i32
    %c0_i32_0 = arith.constant 0 : i32
    return %c0_i32, %arg1 : i32, i32
  }
  func.func @transform_4(%arg0: i32, %arg1: i32) -> (i32, i32) {
    %c0_i32 = arith.constant 0 : i32
    return %arg0, %arg1 : i32, i32
  }
}

module attributes {stable_mosaic.version = 11 : i64} {
  func.func @_conv3x3_s1_kernel(%arg0: i32, %arg1: memref<1x10x10x128xbf16, #tpu.memory_space<vmem>>, %arg2: memref<9x128x128xbf16, #tpu.memory_space<vmem>>, %arg3: memref<1x128xf32, #tpu.memory_space<vmem>>, %arg4: memref<1x128xf32, #tpu.memory_space<vmem>>, %arg5: memref<1x8x8x128xbf16, #tpu.memory_space<vmem>>, %arg6: memref<1x8x8x128xbf16, #tpu.memory_space<vmem>>) attributes {dimension_semantics = [#tpu.dimension_semantics<parallel>], iteration_bounds = array<i64: 2>, scalar_prefetch = 0 : i64, scratch_operands = 0 : i64, tpu.core_type = #tpu.core_type<tc>, window_params = [{transform_indices = @transform_0, window_bounds = array<i64: 1, 10, 10, 128>}, {pipeline_mode = #tpu.pipeline_mode<synchronous>, transform_indices = @transform_1, window_bounds = array<i64: 9, 128, 128>}, {pipeline_mode = #tpu.pipeline_mode<synchronous>, transform_indices = @transform_2, window_bounds = array<i64: 1, 128>}, {pipeline_mode = #tpu.pipeline_mode<synchronous>, transform_indices = @transform_3, window_bounds = array<i64: 1, 128>}, {transform_indices = @transform_4, window_bounds = array<i64: 1, 8, 8, 128>}, {transform_indices = @transform_5, window_bounds = array<i64: 1, 8, 8, 128>}]} {
    %cst = arith.constant 0.000000e+00 : f32
    %0 = vector.broadcast %cst : f32 to vector<64x128xf32>
    %c0 = arith.constant 0 : index
    %c0_0 = arith.constant 0 : index
    %c0_1 = arith.constant 0 : index
    %c0_2 = arith.constant 0 : index
    %1 = vector.load %arg1[%c0, %c0_0, %c0_1, %c0_2] : memref<1x10x10x128xbf16, #tpu.memory_space<vmem>>, vector<1x8x8x128xbf16>
    %2 = vector.shape_cast %1 : vector<1x8x8x128xbf16> to vector<8x8x128xbf16>
    %3 = vector.shape_cast %2 : vector<8x8x128xbf16> to vector<64x128xbf16>
    %c0_3 = arith.constant 0 : index
    %c0_4 = arith.constant 0 : index
    %c0_5 = arith.constant 0 : index
    %4 = vector.load %arg2[%c0_3, %c0_4, %c0_5] : memref<9x128x128xbf16, #tpu.memory_space<vmem>>, vector<1x128x128xbf16>
    %5 = vector.shape_cast %4 : vector<1x128x128xbf16> to vector<128x128xbf16>
    %cst_6 = arith.constant dense<0.000000e+00> : vector<64x128xf32>
    %6 = tpu.matmul %3, %5, %cst_6 {dimension_numbers = #tpu.dot_dimension_numbers<[1], [0], [0], [1], [0, 0, 1, 1], [], []>} : vector<64x128xbf16>, vector<128x128xbf16>, vector<64x128xf32> -> vector<64x128xf32>
    %7 = arith.addf %0, %6 : vector<64x128xf32>
    %c0_7 = arith.constant 0 : index
    %c0_8 = arith.constant 0 : index
    %c1 = arith.constant 1 : index
    %c0_9 = arith.constant 0 : index
    %8 = vector.load %arg1[%c0_7, %c0_8, %c1, %c0_9] : memref<1x10x10x128xbf16, #tpu.memory_space<vmem>>, vector<1x8x8x128xbf16>
    %9 = vector.shape_cast %8 : vector<1x8x8x128xbf16> to vector<8x8x128xbf16>
    %10 = vector.shape_cast %9 : vector<8x8x128xbf16> to vector<64x128xbf16>
    %c1_10 = arith.constant 1 : index
    %c0_11 = arith.constant 0 : index
    %c0_12 = arith.constant 0 : index
    %11 = vector.load %arg2[%c1_10, %c0_11, %c0_12] : memref<9x128x128xbf16, #tpu.memory_space<vmem>>, vector<1x128x128xbf16>
    %12 = vector.shape_cast %11 : vector<1x128x128xbf16> to vector<128x128xbf16>
    %cst_13 = arith.constant dense<0.000000e+00> : vector<64x128xf32>
    %13 = tpu.matmul %10, %12, %cst_13 {dimension_numbers = #tpu.dot_dimension_numbers<[1], [0], [0], [1], [0, 0, 1, 1], [], []>} : vector<64x128xbf16>, vector<128x128xbf16>, vector<64x128xf32> -> vector<64x128xf32>
    %14 = arith.addf %7, %13 : vector<64x128xf32>
    %c0_14 = arith.constant 0 : index
    %c0_15 = arith.constant 0 : index
    %c2 = arith.constant 2 : index
    %c0_16 = arith.constant 0 : index
    %15 = vector.load %arg1[%c0_14, %c0_15, %c2, %c0_16] : memref<1x10x10x128xbf16, #tpu.memory_space<vmem>>, vector<1x8x8x128xbf16>
    %16 = vector.shape_cast %15 : vector<1x8x8x128xbf16> to vector<8x8x128xbf16>
    %17 = vector.shape_cast %16 : vector<8x8x128xbf16> to vector<64x128xbf16>
    %c2_17 = arith.constant 2 : index
    %c0_18 = arith.constant 0 : index
    %c0_19 = arith.constant 0 : index
    %18 = vector.load %arg2[%c2_17, %c0_18, %c0_19] : memref<9x128x128xbf16, #tpu.memory_space<vmem>>, vector<1x128x128xbf16>
    %19 = vector.shape_cast %18 : vector<1x128x128xbf16> to vector<128x128xbf16>
    %cst_20 = arith.constant dense<0.000000e+00> : vector<64x128xf32>
    %20 = tpu.matmul %17, %19, %cst_20 {dimension_numbers = #tpu.dot_dimension_numbers<[1], [0], [0], [1], [0, 0, 1, 1], [], []>} : vector<64x128xbf16>, vector<128x128xbf16>, vector<64x128xf32> -> vector<64x128xf32>
    %21 = arith.addf %14, %20 : vector<64x128xf32>
    %c0_21 = arith.constant 0 : index
    %c1_22 = arith.constant 1 : index
    %c0_23 = arith.constant 0 : index
    %c0_24 = arith.constant 0 : index
    %22 = vector.load %arg1[%c0_21, %c1_22, %c0_23, %c0_24] : memref<1x10x10x128xbf16, #tpu.memory_space<vmem>>, vector<1x8x8x128xbf16>
    %23 = vector.shape_cast %22 : vector<1x8x8x128xbf16> to vector<8x8x128xbf16>
    %24 = vector.shape_cast %23 : vector<8x8x128xbf16> to vector<64x128xbf16>
    %c3 = arith.constant 3 : index
    %c0_25 = arith.constant 0 : index
    %c0_26 = arith.constant 0 : index
    %25 = vector.load %arg2[%c3, %c0_25, %c0_26] : memref<9x128x128xbf16, #tpu.memory_space<vmem>>, vector<1x128x128xbf16>
    %26 = vector.shape_cast %25 : vector<1x128x128xbf16> to vector<128x128xbf16>
    %cst_27 = arith.constant dense<0.000000e+00> : vector<64x128xf32>
    %27 = tpu.matmul %24, %26, %cst_27 {dimension_numbers = #tpu.dot_dimension_numbers<[1], [0], [0], [1], [0, 0, 1, 1], [], []>} : vector<64x128xbf16>, vector<128x128xbf16>, vector<64x128xf32> -> vector<64x128xf32>
    %28 = arith.addf %21, %27 : vector<64x128xf32>
    %c0_28 = arith.constant 0 : index
    %c1_29 = arith.constant 1 : index
    %c1_30 = arith.constant 1 : index
    %c0_31 = arith.constant 0 : index
    %29 = vector.load %arg1[%c0_28, %c1_29, %c1_30, %c0_31] : memref<1x10x10x128xbf16, #tpu.memory_space<vmem>>, vector<1x8x8x128xbf16>
    %30 = vector.shape_cast %29 : vector<1x8x8x128xbf16> to vector<8x8x128xbf16>
    %31 = vector.shape_cast %30 : vector<8x8x128xbf16> to vector<64x128xbf16>
    %c4 = arith.constant 4 : index
    %c0_32 = arith.constant 0 : index
    %c0_33 = arith.constant 0 : index
    %32 = vector.load %arg2[%c4, %c0_32, %c0_33] : memref<9x128x128xbf16, #tpu.memory_space<vmem>>, vector<1x128x128xbf16>
    %33 = vector.shape_cast %32 : vector<1x128x128xbf16> to vector<128x128xbf16>
    %cst_34 = arith.constant dense<0.000000e+00> : vector<64x128xf32>
    %34 = tpu.matmul %31, %33, %cst_34 {dimension_numbers = #tpu.dot_dimension_numbers<[1], [0], [0], [1], [0, 0, 1, 1], [], []>} : vector<64x128xbf16>, vector<128x128xbf16>, vector<64x128xf32> -> vector<64x128xf32>
    %35 = arith.addf %28, %34 : vector<64x128xf32>
    %c0_35 = arith.constant 0 : index
    %c1_36 = arith.constant 1 : index
    %c2_37 = arith.constant 2 : index
    %c0_38 = arith.constant 0 : index
    %36 = vector.load %arg1[%c0_35, %c1_36, %c2_37, %c0_38] : memref<1x10x10x128xbf16, #tpu.memory_space<vmem>>, vector<1x8x8x128xbf16>
    %37 = vector.shape_cast %36 : vector<1x8x8x128xbf16> to vector<8x8x128xbf16>
    %38 = vector.shape_cast %37 : vector<8x8x128xbf16> to vector<64x128xbf16>
    %c5 = arith.constant 5 : index
    %c0_39 = arith.constant 0 : index
    %c0_40 = arith.constant 0 : index
    %39 = vector.load %arg2[%c5, %c0_39, %c0_40] : memref<9x128x128xbf16, #tpu.memory_space<vmem>>, vector<1x128x128xbf16>
    %40 = vector.shape_cast %39 : vector<1x128x128xbf16> to vector<128x128xbf16>
    %cst_41 = arith.constant dense<0.000000e+00> : vector<64x128xf32>
    %41 = tpu.matmul %38, %40, %cst_41 {dimension_numbers = #tpu.dot_dimension_numbers<[1], [0], [0], [1], [0, 0, 1, 1], [], []>} : vector<64x128xbf16>, vector<128x128xbf16>, vector<64x128xf32> -> vector<64x128xf32>
    %42 = arith.addf %35, %41 : vector<64x128xf32>
    %c0_42 = arith.constant 0 : index
    %c2_43 = arith.constant 2 : index
    %c0_44 = arith.constant 0 : index
    %c0_45 = arith.constant 0 : index
    %43 = vector.load %arg1[%c0_42, %c2_43, %c0_44, %c0_45] : memref<1x10x10x128xbf16, #tpu.memory_space<vmem>>, vector<1x8x8x128xbf16>
    %44 = vector.shape_cast %43 : vector<1x8x8x128xbf16> to vector<8x8x128xbf16>
    %45 = vector.shape_cast %44 : vector<8x8x128xbf16> to vector<64x128xbf16>
    %c6 = arith.constant 6 : index
    %c0_46 = arith.constant 0 : index
    %c0_47 = arith.constant 0 : index
    %46 = vector.load %arg2[%c6, %c0_46, %c0_47] : memref<9x128x128xbf16, #tpu.memory_space<vmem>>, vector<1x128x128xbf16>
    %47 = vector.shape_cast %46 : vector<1x128x128xbf16> to vector<128x128xbf16>
    %cst_48 = arith.constant dense<0.000000e+00> : vector<64x128xf32>
    %48 = tpu.matmul %45, %47, %cst_48 {dimension_numbers = #tpu.dot_dimension_numbers<[1], [0], [0], [1], [0, 0, 1, 1], [], []>} : vector<64x128xbf16>, vector<128x128xbf16>, vector<64x128xf32> -> vector<64x128xf32>
    %49 = arith.addf %42, %48 : vector<64x128xf32>
    %c0_49 = arith.constant 0 : index
    %c2_50 = arith.constant 2 : index
    %c1_51 = arith.constant 1 : index
    %c0_52 = arith.constant 0 : index
    %50 = vector.load %arg1[%c0_49, %c2_50, %c1_51, %c0_52] : memref<1x10x10x128xbf16, #tpu.memory_space<vmem>>, vector<1x8x8x128xbf16>
    %51 = vector.shape_cast %50 : vector<1x8x8x128xbf16> to vector<8x8x128xbf16>
    %52 = vector.shape_cast %51 : vector<8x8x128xbf16> to vector<64x128xbf16>
    %c7 = arith.constant 7 : index
    %c0_53 = arith.constant 0 : index
    %c0_54 = arith.constant 0 : index
    %53 = vector.load %arg2[%c7, %c0_53, %c0_54] : memref<9x128x128xbf16, #tpu.memory_space<vmem>>, vector<1x128x128xbf16>
    %54 = vector.shape_cast %53 : vector<1x128x128xbf16> to vector<128x128xbf16>
    %cst_55 = arith.constant dense<0.000000e+00> : vector<64x128xf32>
    %55 = tpu.matmul %52, %54, %cst_55 {dimension_numbers = #tpu.dot_dimension_numbers<[1], [0], [0], [1], [0, 0, 1, 1], [], []>} : vector<64x128xbf16>, vector<128x128xbf16>, vector<64x128xf32> -> vector<64x128xf32>
    %56 = arith.addf %49, %55 : vector<64x128xf32>
    %c0_56 = arith.constant 0 : index
    %c2_57 = arith.constant 2 : index
    %c2_58 = arith.constant 2 : index
    %c0_59 = arith.constant 0 : index
    %57 = vector.load %arg1[%c0_56, %c2_57, %c2_58, %c0_59] : memref<1x10x10x128xbf16, #tpu.memory_space<vmem>>, vector<1x8x8x128xbf16>
    %58 = vector.shape_cast %57 : vector<1x8x8x128xbf16> to vector<8x8x128xbf16>
    %59 = vector.shape_cast %58 : vector<8x8x128xbf16> to vector<64x128xbf16>
    %c8 = arith.constant 8 : index
    %c0_60 = arith.constant 0 : index
    %c0_61 = arith.constant 0 : index
    %60 = vector.load %arg2[%c8, %c0_60, %c0_61] : memref<9x128x128xbf16, #tpu.memory_space<vmem>>, vector<1x128x128xbf16>
    %61 = vector.shape_cast %60 : vector<1x128x128xbf16> to vector<128x128xbf16>
    %cst_62 = arith.constant dense<0.000000e+00> : vector<64x128xf32>
    %62 = tpu.matmul %59, %61, %cst_62 {dimension_numbers = #tpu.dot_dimension_numbers<[1], [0], [0], [1], [0, 0, 1, 1], [], []>} : vector<64x128xbf16>, vector<128x128xbf16>, vector<64x128xf32> -> vector<64x128xf32>
    %63 = arith.addf %56, %62 : vector<64x128xf32>
    %c0_63 = arith.constant 0 : index
    %c0_64 = arith.constant 0 : index
    %64 = vector.load %arg3[%c0_63, %c0_64] : memref<1x128xf32, #tpu.memory_space<vmem>>, vector<1x128xf32>
    %65 = vector.broadcast %64 : vector<1x128xf32> to vector<64x128xf32>
    %66 = arith.mulf %63, %65 : vector<64x128xf32>
    %c0_65 = arith.constant 0 : index
    %c0_66 = arith.constant 0 : index
    %67 = vector.load %arg4[%c0_65, %c0_66] : memref<1x128xf32, #tpu.memory_space<vmem>>, vector<1x128xf32>
    %68 = vector.broadcast %67 : vector<1x128xf32> to vector<64x128xf32>
    %69 = arith.addf %66, %68 : vector<64x128xf32>
    %c0_67 = arith.constant 0 : index
    %c0_68 = arith.constant 0 : index
    %c0_69 = arith.constant 0 : index
    %c0_70 = arith.constant 0 : index
    %70 = vector.load %arg5[%c0_67, %c0_68, %c0_69, %c0_70] : memref<1x8x8x128xbf16, #tpu.memory_space<vmem>>, vector<1x8x8x128xbf16>
    %71 = vector.shape_cast %70 : vector<1x8x8x128xbf16> to vector<8x8x128xbf16>
    %72 = vector.shape_cast %71 : vector<8x8x128xbf16> to vector<64x128xbf16>
    %73 = arith.extf %72 : vector<64x128xbf16> to vector<64x128xf32>
    %74 = arith.addf %69, %73 : vector<64x128xf32>
    %cst_71 = arith.constant 0.000000e+00 : f32
    %75 = vector.broadcast %cst_71 : f32 to vector<64x128xf32>
    %76 = arith.maximumf %74, %75 : vector<64x128xf32>
    %77 = vector.shape_cast %76 : vector<64x128xf32> to vector<8x8x128xf32>
    %78 = arith.truncf %77 : vector<8x8x128xf32> to vector<8x8x128xbf16>
    %c0_72 = arith.constant 0 : index
    %c0_73 = arith.constant 0 : index
    %c0_74 = arith.constant 0 : index
    %c0_75 = arith.constant 0 : index
    %79 = vector.load %arg6[%c0_72, %c0_73, %c0_74, %c0_75] : memref<1x8x8x128xbf16, #tpu.memory_space<vmem>>, vector<1x8x8x128xbf16>
    %80 = vector.shape_cast %79 : vector<1x8x8x128xbf16> to vector<8x8x128xbf16>
    %81 = vector.shape_cast %78 : vector<8x8x128xbf16> to vector<1x8x8x128xbf16>
    tpu.vector_store %arg6[%c0_72, %c0_73, %c0_74, %c0_75], %81 {strides = array<i32>} : memref<1x8x8x128xbf16, #tpu.memory_space<vmem>>, vector<1x8x8x128xbf16>,
    return
  }
  func.func @transform_0(%arg0: i32) -> (i32, i32, i32, i32) {
    %c0_i32 = arith.constant 0 : i32
    %c0_i32_0 = arith.constant 0 : i32
    %c0_i32_1 = arith.constant 0 : i32
    %c0_i32_2 = arith.constant 0 : i32
    return %arg0, %c0_i32, %c0_i32_0, %c0_i32_1 : i32, i32, i32, i32
  }
  func.func @transform_1(%arg0: i32) -> (i32, i32, i32) {
    %c0_i32 = arith.constant 0 : i32
    %c0_i32_0 = arith.constant 0 : i32
    %c0_i32_1 = arith.constant 0 : i32
    %c0_i32_2 = arith.constant 0 : i32
    return %c0_i32, %c0_i32_0, %c0_i32_1 : i32, i32, i32
  }
  func.func @transform_2(%arg0: i32) -> (i32, i32) {
    %c0_i32 = arith.constant 0 : i32
    %c0_i32_0 = arith.constant 0 : i32
    %c0_i32_1 = arith.constant 0 : i32
    return %c0_i32, %c0_i32_0 : i32, i32
  }
  func.func @transform_3(%arg0: i32) -> (i32, i32) {
    %c0_i32 = arith.constant 0 : i32
    %c0_i32_0 = arith.constant 0 : i32
    %c0_i32_1 = arith.constant 0 : i32
    return %c0_i32, %c0_i32_0 : i32, i32
  }
  func.func @transform_4(%arg0: i32) -> (i32, i32, i32, i32) {
    %c0_i32 = arith.constant 0 : i32
    %c0_i32_0 = arith.constant 0 : i32
    %c0_i32_1 = arith.constant 0 : i32
    %c0_i32_2 = arith.constant 0 : i32
    return %arg0, %c0_i32, %c0_i32_0, %c0_i32_1 : i32, i32, i32, i32
  }
  func.func @transform_5(%arg0: i32) -> (i32, i32, i32, i32) {
    %c0_i32 = arith.constant 0 : i32
    %c0_i32_0 = arith.constant 0 : i32
    %c0_i32_1 = arith.constant 0 : i32
    %c0_i32_2 = arith.constant 0 : i32
    return %arg0, %c0_i32, %c0_i32_0, %c0_i32_1 : i32, i32, i32, i32
  }
}

</mosaic_0001>

<bundles_post_ra>
// kernel: basic_block_forward.3
= control target key start
LH: loop header
LB: loop body
LE: loop exit
PB: predicated region body
PF: predicated region fallthrough
CT: control target
= control target key end

     0   :  { %s2160_s15 = smov 0   ;;  %s2162_s16 = smov 0   ;;  %s2463_s0 = inlined_call_operand.vmem [shape: bf16[128,1152], index: 0, kind: input, shape index: {}]   ;;  %s2464_s1 = inlined_call_operand.vmem [shape: bf16[1152,128], index: 1, kind: input, shape index: {}]   ;;  %s2465_s2 = inlined_call_operand.vmem [shape: f32[1,128], index: 2, kind: input, shape index: {}]   ;;  %s2466_s3 = inlined_call_operand.vmem [shape: f32[1,128], index: 3, kind: input, shape index: {}]   ;;  %s2467_s4 = inlined_call_operand.vmem [shape: bf16[128,128], index: 4, kind: output, shape index: {}]  }
   0x1   :  { %s2164_s17 = smov 0  }
   0x2 LB: > { %s26_s18 = sadd.s32 1, %s2129_s16  ;;  %p1594_p0 = scmp.ge.s32.totalorder %s2133_s17, 1  ;;  %s2133_s17 = sphi %s2164_s17, %s14_s17   ;;  %s2129_s16 = sphi %s2162_s16, %s2469_s16   ;;  %s2125_s15 = sphi %s2160_s15, %s2468_s15  }
   0x3   : > { %p28_p1 = scmp.ge.s32.totalorder %s26_s18, 2  ;;  %p203_p2 = scmp.lt.s32.totalorder %s2133_s17, 3 }
   0x5   : > { %s2471_s18 = smov (%p28_p1, %s26_s18), 0  ;;  %p204_p3 = pnand %p1594_p0, %p203_p2 }
   0x6   : > { %v1987_v0 = vld [vmem:[%s2464_s1 + $0x40] sm:$0xff] (!%p204_p3)   ;;  %v1991_v4 = vld [vmem:[%s2464_s1 + $0x48] sm:$0xff] (!%p204_p3)   ;;  %v1995_v8 = vld [vmem:[%s2464_s1 + $0x50] sm:$0xff] (!%p204_p3)   ;;  %s1595_s27 = sshll.u32 (!%p204_p3), %s2125_s15, 3 }
   0x7   : > { %207 = sbr.rel (%p204_p3) target bundleno = 332 (0x14c), region = 36  ;;  %v1988_v1 = vld [vmem:[%s2464_s1 + $0xc0] sm:$0xff] (!%p204_p3)   ;;  %1750 = vmatprep.subr.bf16.mxu0 (!%p204_p3), %v1987_v0  ;;  %v1992_v5 = vld [vmem:[%s2464_s1 + $0xc8] sm:$0xff] (!%p204_p3)   ;;  %v1996_v9 = vld [vmem:[%s2464_s1 + $0xd0] sm:$0xff] (!%p204_p3)   ;;  %p244_p4 = scmp.lt.s32.totalorder (!%p204_p3), %s1595_s27, 15 }
   0x8   : > { %v1989_v2 = vld [vmem:[%s2464_s1] sm:$0xff] (!%p204_p3)   ;;  %1790 = vmatprep.subr.bf16.mxu1 (!%p204_p3), %v1988_v1  ;;  %v1993_v6 = vld [vmem:[%s2464_s1 + $0x8] sm:$0xff] (!%p204_p3)   ;;  %v1997_v10 = vld [vmem:[%s2464_s1 + $0x10] sm:$0xff] (!%p204_p3)  }
   0x9   : > { %v1990_v3 = vld [vmem:[%s2464_s1 + $0x80] sm:$0xff] (!%p204_p3)   ;;  %1751 = vmatpush3.bf16.msra.mxu0 (!%p204_p3), %v1989_v2  ;;  %v1994_v7 = vld [vmem:[%s2464_s1 + $0x88] sm:$0xff] (!%p204_p3)   ;;  %v1998_v11 = vld [vmem:[%s2464_s1 + $0x90] sm:$0xff] (!%p204_p3)  }
   0xa   : > { %1791 = vmatpush3.bf16.msra.mxu1 (!%p204_p3), %v1990_v3  ;;  %1752 = vmatprep.subr.bf16.mxu0 (!%p204_p3), %v1991_v4  ;;  %v1999_v12 = vld [vmem:[%s2464_s1 + $0x58] sm:$0xff] (!%p204_p3)   ;;  %v2003_v16 = vld [vmem:[%s2464_s1 + $0x60] sm:$0xff] (!%p204_p3)   ;;  %v2007_v20 = vld [vmem:[%s2464_s1 + $0x68] sm:$0xff] (!%p204_p3)  }
   0xb   : > { %1792 = vmatprep.subr.bf16.mxu1 (!%p204_p3), %v1992_v5  ;;  %v2000_v13 = vld [vmem:[%s2464_s1 + $0xd8] sm:$0xff] (!%p204_p3)   ;;  %v2004_v17 = vld [vmem:[%s2464_s1 + $0xe0] sm:$0xff] (!%p204_p3)   ;;  %v2008_v21 = vld [vmem:[%s2464_s1 + $0xe8] sm:$0xff] (!%p204_p3)  }
   0xc   : > { %v2001_v14 = vld [vmem:[%s2464_s1 + $0x18] sm:$0xff] (!%p204_p3)   ;;  %v2005_v18 = vld [vmem:[%s2464_s1 + $0x20] sm:$0xff] (!%p204_p3)   ;;  %v2009_v22 = vld [vmem:[%s2464_s1 + $0x28] sm:$0xff] (!%p204_p3)  }
   0xd   : > { %1753 = vmatpush3.bf16.msra.mxu0 (!%p204_p3), %v1993_v6  ;;  %v2002_v15 = vld [vmem:[%s2464_s1 + $0x98] sm:$0xff] (!%p204_p3)   ;;  %v2006_v19 = vld [vmem:[%s2464_s1 + $0xa0] sm:$0xff] (!%p204_p3)   ;;  %v2010_v23 = vld [vmem:[%s2464_s1 + $0xa8] sm:$0xff] (!%p204_p3)  }
   0xe   : > { %1793 = vmatpush3.bf16.msra.mxu1 %v1994_v7  ;;  %1754 = vmatprep.subr.bf16.mxu0 %v1995_v8  ;;  %s2473_s27 = smov (!%p244_p4, %s1595_s27), 15  ;;  %v2011_v24 = vld [vmem:[%s2464_s1 + $0x70] sm:$0xff]   ;;  %v2015_v28 = vld [vmem:[%s2464_s1 + $0x78] sm:$0xff]   ;;  %v2025_v36 = vld [vmem:[%s2464_s1 + $0x140] sm:$0xff]  }
   0xf   : > { %1794 = vmatprep.subr.bf16.mxu1 %v1996_v9  ;;  %v2012_v25 = vld [vmem:[%s2464_s1 + $0xf0] sm:$0xff]   ;;  %s1962_s28 = smul.u32 36, %s2473_s27  ;;  %v2016_v29 = vld [vmem:[%s2464_s1 + $0xf8] sm:$0xff]   ;;  %v2026_v37 = vld [vmem:[%s2464_s1 + $0x1c0] sm:$0xff]   ;;  %s1598_s20 = sshll.u32 %s2473_s27, 2 }
  0x10   : > { %v2013_v26 = vld [vmem:[%s2464_s1 + $0x30] sm:$0xff]   ;;  %v2017_v30 = vld [vmem:[%s2464_s1 + $0x38] sm:$0xff]   ;;  %v2027_v38 = vld [vmem:[%s2464_s1 + $0x100] sm:$0xff]   ;;  %s267_s23 = scalar_lea.vmem %s2467_s4, %s1598_s20 }
  0x11   : > { %1755 = vmatpush3.bf16.msra.mxu0 %v1997_v10  ;;  %v2014_v27 = vld [vmem:[%s2464_s1 + $0xb0] sm:$0xff]   ;;  %s2277_s12 = scalar_lea.vmem %s2463_s0, %s1962_s28  ;;  %v2018_v31 = vld [vmem:[%s2464_s1 + $0xb8] sm:$0xff]   ;;  %v2028_v39 = vld [vmem:[%s2464_s1 + $0x180] sm:$0xff]  }
  0x12   : > { %1795 = vmatpush3.bf16.msra.mxu1 %v1998_v11  ;;  %1756 = vmatprep.subr.bf16.mxu0 %v1999_v12  ;;  %v2019_v32 = vld [vmem:[%s2277_s12] ss:$36 sps:$4 sm:$0xff]   ;;  %v2022_v34 = vld [vmem:[%s2277_s12 + $0x8] ss:$36 sps:$4 sm:$0xff]   ;;  %v2035_v45 = vld [vmem:[%s2277_s12 + $0x54] ss:$36 sps:$4 sm:$0xff]  }
  0x13   : > { %1796 = vmatprep.subr.bf16.mxu1 %v2000_v13  ;;  %v2021_v33 = vld [vmem:[%s2277_s12 + $0x4] ss:$36 sps:$4 sm:$0xff]   ;;  %v2024_v35 = vld [vmem:[%s2277_s12 + $0xc] ss:$36 sps:$4 sm:$0xff]   ;;  %v2043_v52 = vld [vmem:[%s2464_s1 + $0x158] sm:$0xff]  }
  0x14   : > { %1102 = vmatprep.mubr.bf16.mxu0 %v2021_v33  ;;  %1167 = vmatprep.mubr.bf16.mxu1 %v2024_v35  ;;  %v2029_v40 = vld [vmem:[%s2464_s1 + $0x148] sm:$0xff]   ;;  %v2038_v47 = vld [vmem:[%s2277_s12 + $0x50] ss:$36 sps:$4 sm:$0xff]   ;;  %v2044_v53 = vld [vmem:[%s2464_s1 + $0x1d8] sm:$0xff]  }
  0x15   : > { %1757 = vmatpush3.bf16.msra.mxu0 %v2001_v14  ;;  %v2030_v41 = vld [vmem:[%s2464_s1 + $0x1c8] sm:$0xff]   ;;  %v2039_v48 = vld [vmem:[%s2464_s1 + $0x150] sm:$0xff]   ;;  %v2045_v54 = vld [vmem:[%s2464_s1 + $0x118] sm:$0xff]  }
  0x16   : > { %1797 = vmatpush3.bf16.msra.mxu1 %v2002_v15  ;;  %1758 = vmatprep.subr.bf16.mxu0 %v2003_v16  ;;  %v2031_v42 = vld [vmem:[%s2464_s1 + $0x108] sm:$0xff]   ;;  %v2040_v49 = vld [vmem:[%s2464_s1 + $0x1d0] sm:$0xff]   ;;  %v2046_v55 = vld [vmem:[%s2464_s1 + $0x198] sm:$0xff]  }
  0x17   : > { %1798 = vmatprep.subr.bf16.mxu1 %v2004_v17  ;;  %v2032_v43 = vld [vmem:[%s2464_s1 + $0x188] sm:$0xff]   ;;  %v2041_v50 = vld [vmem:[%s2464_s1 + $0x110] sm:$0xff]   ;;  %v2049_v57 = vld [vmem:[%s2277_s12 + $0x9c] ss:$36 sps:$4 sm:$0xff]  }
  0x18   : > { %v2033_v44 = vld [vmem:[%s2277_s12 + $0x4c] ss:$36 sps:$4 sm:$0xff]   ;;  %v2047_v56 = vld [vmem:[%s2277_s12 + $0x94] ss:$36 sps:$4 sm:$0xff]   ;;  %v2053_v60 = vld [vmem:[%s2464_s1 + $0x160] sm:$0xff]  }
  0x19   : > { %1759 = vmatpush3.bf16.msra.mxu0 %v2005_v18  ;;  %v2037_v46 = vld [vmem:[%s2277_s12 + $0x48] ss:$36 sps:$4 sm:$0xff]   ;;  %v2042_v51 = vld [vmem:[%s2464_s1 + $0x190] sm:$0xff]   ;;  %v2052_v59 = vld [vmem:[%s2277_s12 + $0x98] ss:$36 sps:$4 sm:$0xff]  }
  0x1a   : > { %1799 = vmatpush3.bf16.msra.mxu1 %v2006_v19  ;;  %1760 = vmatprep.subr.bf16.mxu0 %v2007_v20  ;;  %v2051_v58 = vld [vmem:[%s2277_s12 + $0x90] ss:$36 sps:$4 sm:$0xff]   ;;  %v2054_v61 = vld [vmem:[%s2464_s1 + $0x1e0] sm:$0xff]   ;;  %v2057_v0 = vld [vmem:[%s2464_s1 + $0x168] sm:$0xff]  }
  0x1b   : > { %1800 = vmatprep.subr.bf16.mxu1 %v2008_v21  ;;  %v2055_v62 = vld [vmem:[%s2464_s1 + $0x120] sm:$0xff]   ;;  %v2058_v1 = vld [vmem:[%s2464_s1 + $0x1e8] sm:$0xff]   ;;  %v2065_v6 = vld [vmem:[%s2277_s12 + $0xd8] ss:$36 sps:$4 sm:$0xff]  }
  0x1c   : > { %v2056_v63 = vld [vmem:[%s2464_s1 + $0x1a0] sm:$0xff]   ;;  %v2059_v2 = vld [vmem:[%s2464_s1 + $0x128] sm:$0xff]   ;;  %v2067_v8 = vld [vmem:[%s2464_s1 + $0x170] sm:$0xff]  }
  0x1d   : > { %1761 = vmatpush3.bf16.msra.mxu0 %v2009_v22  ;;  %v2060_v3 = vld [vmem:[%s2464_s1 + $0x1a8] sm:$0xff]   ;;  %v2061_v4 = vld [vmem:[%s2277_s12 + $0xdc] ss:$36 sps:$4 sm:$0xff]   ;;  %v2068_v9 = vld [vmem:[%s2464_s1 + $0x1f0] sm:$0xff]  }
  0x1e   : > { %1801 = vmatpush3.bf16.msra.mxu1 %v2010_v23  ;;  %1762 = vmatprep.subr.bf16.mxu0 %v2011_v24  ;;  %v2063_v5 = vld [vmem:[%s2277_s12 + $0xe4] ss:$36 sps:$4 sm:$0xff]   ;;  %v2069_v10 = vld [vmem:[%s2464_s1 + $0x130] sm:$0xff]   ;;  %v2071_v12 = vld [vmem:[%s2464_s1 + $0x178] sm:$0xff]  }
  0x1f   : > { %1802 = vmatprep.subr.bf16.mxu1 %v2012_v25  ;;  %v2066_v7 = vld [vmem:[%s2277_s12 + $0xe0] ss:$36 sps:$4 sm:$0xff]   ;;  %v2070_v11 = vld [vmem:[%s2464_s1 + $0x1b0] sm:$0xff]   ;;  %v2072_v13 = vld [vmem:[%s2464_s1 + $0x1f8] sm:$0xff]  }
  0x20   : > { %v2073_v14 = vld [vmem:[%s2464_s1 + $0x138] sm:$0xff]   ;;  %v2075_v16 = vld [vmem:[%s2277_s12 + $0x10] ss:$36 sps:$4 sm:$0xff]   ;;  %v2081_v20 = vld [vmem:[%s2464_s1 + $0x200] sm:$0xff]  }
  0x21   : > { %1763 = vmatpush3.bf16.msra.mxu0 %v2013_v26  ;;  %v2074_v15 = vld [vmem:[%s2464_s1 + $0x1b8] sm:$0xff]   ;;  %v2082_v21 = vld [vmem:[%s2464_s1 + $0x208] sm:$0xff]   ;;  %v2088_v25 = vld [vmem:[%s2277_s12 + $0x60] ss:$36 sps:$4 sm:$0xff]  }
  0x22   : > { %1803 = vmatpush3.bf16.msra.mxu1 %v2014_v27  ;;  %1764 = vmatprep.subr.bf16.mxu0 %v2015_v28  ;;  %v2077_v17 = vld [vmem:[%s2277_s12 + $0x14] ss:$36 sps:$4 sm:$0xff]   ;;  %v2080_v19 = vld [vmem:[%s2277_s12 + $0x1c] ss:$36 sps:$4 sm:$0xff]   ;;  %v2085_v23 = vld [vmem:[%s2277_s12 + $0x64] ss:$36 sps:$4 sm:$0xff]  }
  0x23   : > { %1804 = vmatprep.subr.bf16.mxu1 %v2016_v29  ;;  %v2078_v18 = vld [vmem:[%s2277_s12 + $0x18] ss:$36 sps:$4 sm:$0xff]   ;;  %v2089_v26 = vld [vmem:[%s2464_s1 + $0x210] sm:$0xff]   ;;  %v2091_v27 = vld [vmem:[%s2277_s12 + $0xa4] ss:$36 sps:$4 sm:$0xff]  }
  0x24   : > { %v2083_v22 = vld [vmem:[%s2277_s12 + $0x5c] ss:$36 sps:$4 sm:$0xff]   ;;  %v2093_v28 = vld [vmem:[%s2277_s12 + $0xac] ss:$36 sps:$4 sm:$0xff]  }
  0x25   : > { %1765 = vmatpush3.bf16.msra.mxu0 %v2017_v30  ;;  %v2087_v24 = vld [vmem:[%s2277_s12 + $0x58] ss:$36 sps:$4 sm:$0xff]   ;;  %v2095_v30 = vld [vmem:[%s2277_s12 + $0xa0] ss:$36 sps:$4 sm:$0xff]   ;;  %v2099_v33 = vld [vmem:[%s2277_s12 + $0xec] ss:$36 sps:$4 sm:$0xff]  }
  0x26   : > { %1805 = vmatpush3.bf16.msra.mxu1 %v2018_v31  ;;  %1830 = vmatprep.subr.bf16.mxu0 %v2025_v36  ;;  %v2090_v29 = vld [vmem:[%s2464_s1 + $0x218] sm:$0xff]   ;;  %v2096_v31 = vld [vmem:[%s2277_s12 + $0xa8] ss:$36 sps:$4 sm:$0xff]  }
  0x27   : > { %1870 = vmatprep.subr.bf16.mxu1 %v2026_v37  ;;  %v2098_v35 = vld [vmem:[%s2464_s1 + $0x228] sm:$0xff]   ;;  %v2105_v37 = vld [vmem:[%s2464_s1 + $0x230] sm:$0xff]  }
  0x28   : > { %1103 = vmatmul.mubr.bf16.vlgmr.msra.gmra.mrb[0].mxu0 %v2019_v32  ;;  %v2097_v32 = vld [vmem:[%s2464_s1 + $0x220] sm:$0xff]   ;;  %v2103_v36 = vld [vmem:[%s2277_s12 + $0xe8] ss:$36 sps:$4 sm:$0xff]  }
  0x29   : > { %1168 = vmatmul.mubr.bf16.vlgmr.msra.gmra.mrb[0].mxu1 %v2022_v34  ;;  %1831 = vmatpush3.bf16.msra.mxu0 %v2027_v38  ;;  %v2101_v34 = vld [vmem:[%s2277_s12 + $0xf4] ss:$36 sps:$4 sm:$0xff]  }
  0x2a   : > { %1871 = vmatpush3.bf16.msra.mxu1 %v2028_v39  ;;  %1832 = vmatprep.subr.bf16.mxu0 %v2029_v40  ;;  %v2104_v38 = vld [vmem:[%s2277_s12 + $0xf0] ss:$36 sps:$4 sm:$0xff]   ;;  %v2107_v39 = vld [vmem:[%s2277_s12 + $0x20] ss:$36 sps:$4 sm:$0xff]  }
  0x2b   : > { %1872 = vmatprep.subr.bf16.mxu1 %v2030_v41  ;;  %1110 = vmatprep.mubr.bf16.mxu0 %v2033_v44  ;;  %v2108_v40 = vld [vmem:[%s2277_s12 + $0xb0] ss:$36 sps:$4 sm:$0xff]   ;;  %v2106_v41 = vld [vmem:[%s2464_s1 + $0x238] sm:$0xff]  }
  0x2c   : > { %1175 = vmatprep.mubr.bf16.mxu1 %v2035_v45 }
  0x2d   : > { %1833 = vmatpush3.bf16.msra.mxu0 %v2031_v42  ;;  %v2109_v42 = vld [vmem:[%s2277_s12 + $0x68] ss:$36 sps:$4 sm:$0xff]  }
  0x2e   : > { %1873 = vmatpush3.bf16.msra.mxu1 %v2032_v43  ;;  %1834 = vmatprep.subr.bf16.mxu0 %v2039_v48  ;;  %v2110_v43 = vld [vmem:[%s2277_s12 + $0xf8] ss:$36 sps:$4 sm:$0xff]  }
  0x2f   : > { %1874 = vmatprep.subr.bf16.mxu1 %v2040_v49 }
  0x30   : > { %1111 = vmatmul.mubr.bf16.gmra.mrb[4].mxu0 %v2037_v46 }
  0x31   : > { %1176 = vmatmul.mubr.bf16.gmra.mrb[4].mxu1 %v2038_v47  ;;  %1835 = vmatpush3.bf16.msra.mxu0 %v2041_v50 }
  0x32   : > { %1875 = vmatpush3.bf16.msra.mxu1 %v2042_v51  ;;  %1836 = vmatprep.subr.bf16.mxu0 %v2043_v52 }
  0x33   : > { %1876 = vmatprep.subr.bf16.mxu1 %v2044_v53  ;;  %1118 = vmatprep.mubr.bf16.mxu0 %v2047_v56 }
  0x34   : > { %1183 = vmatprep.mubr.bf16.mxu1 %v2049_v57 }
  0x35   : > { %1837 = vmatpush3.bf16.msra.mxu0 %v2045_v54 }
  0x36   : > { %1877 = vmatpush3.bf16.msra.mxu1 %v2046_v55  ;;  %1838 = vmatprep.subr.bf16.mxu0 %v2053_v60 }
  0x37   : > { %1878 = vmatprep.subr.bf16.mxu1 %v2054_v61 }
  0x38   : > { %1119 = vmatmul.mubr.bf16.gmra.mrb[8].mxu0 %v2051_v58 }
  0x39   : > { %1184 = vmatmul.mubr.bf16.gmra.mrb[8].mxu1 %v2052_v59  ;;  %1839 = vmatpush3.bf16.msra.mxu0 %v2055_v62 }
  0x3a   : > { %1879 = vmatpush3.bf16.msra.mxu1 %v2056_v63  ;;  %1840 = vmatprep.subr.bf16.mxu0 %v2057_v0 }
  0x3b   : > { %1880 = vmatprep.subr.bf16.mxu1 %v2058_v1  ;;  %1126 = vmatprep.mubr.bf16.mxu0 %v2061_v4 }
  0x3c   : > { %1191 = vmatprep.mubr.bf16.mxu1 %v2063_v5 }
  0x3d   : > { %1841 = vmatpush3.bf16.msra.mxu0 %v2059_v2 }
  0x3e   : > { %1881 = vmatpush3.bf16.msra.mxu1 %v2060_v3  ;;  %1842 = vmatprep.subr.bf16.mxu0 %v2067_v8 }
  0x3f   : > { %1882 = vmatprep.subr.bf16.mxu1 %v2068_v9 }
  0x40   : > { %1127 = vmatmul.mubr.bf16.gmra.mrb[12].mxu0 %v2065_v6 }
  0x41   : > { %1192 = vmatmul.mubr.bf16.gmra.mrb[12].mxu1 %v2066_v7  ;;  %1843 = vmatpush3.bf16.msra.mxu0 %v2069_v10 }
  0x42   : > { %1883 = vmatpush3.bf16.msra.mxu1 %v2070_v11  ;;  %1844 = vmatprep.subr.bf16.mxu0 %v2071_v12 }
  0x43   : > { %1884 = vmatprep.subr.bf16.mxu1 %v2072_v13  ;;  %1232 = vmatprep.mubr.bf16.mxu0 %v2077_v17 }
  0x44   : > { %1297 = vmatprep.mubr.bf16.mxu1 %v2080_v19 }
  0x45   : > { %1845 = vmatpush3.bf16.msra.mxu0 %v2073_v14 }
  0x46   : > { %1885 = vmatpush3.bf16.msra.mxu1 %v2074_v15  ;;  %1922 = vmatprep.subr.bf16.mxu0 %v2081_v20 }
  0x47   : > { %1946 = vmatprep.subr.bf16.mxu1 %v2081_v20 }
  0x48   : > { %1233 = vmatmul.mubr.bf16.vlgmr.msra.gmra.mrb[16].mxu0 %v2075_v16 }
  0x49   : > { %1298 = vmatmul.mubr.bf16.vlgmr.msra.gmra.mrb[16].mxu1 %v2078_v18  ;;  %1923 = vmatpush3.bf16.msra.mxu0 %v2081_v20 }
  0x4a   : > { %1954 = vmatpush3.bf16.msra.mxu1 %v2081_v20  ;;  %1924 = vmatprep.subr.bf16.mxu0 %v2082_v21 }
  0x4b   : > { %1947 = vmatprep.subr.bf16.mxu1 %v2082_v21  ;;  %1240 = vmatprep.mubr.bf16.mxu0 %v2083_v22 }
  0x4c   : > { %1305 = vmatprep.mubr.bf16.mxu1 %v2085_v23 }
  0x4d   : > { %1925 = vmatpush3.bf16.msra.mxu0 %v2082_v21 }
  0x4e   : > { %1955 = vmatpush3.bf16.msra.mxu1 %v2082_v21  ;;  %1926 = vmatprep.subr.bf16.mxu0 %v2089_v26 }
  0x4f   : > { %1948 = vmatprep.subr.bf16.mxu1 %v2089_v26 }
  0x50   : > { %1241 = vmatmul.mubr.bf16.gmra.mrb[20].mxu0 %v2087_v24 }
  0x51   : > { %1306 = vmatmul.mubr.bf16.gmra.mrb[20].mxu1 %v2088_v25  ;;  %1248 = vmatprep.mubr.bf16.mxu0 %v2091_v27 }
  0x52   : > { %1927 = vmatpush3.bf16.msra.mxu0 %v2089_v26  ;;  %1313 = vmatprep.mubr.bf16.mxu1 %v2093_v28 }
  0x53   : > { %1956 = vmatpush3.bf16.msra.mxu1 %v2089_v26  ;;  %1928 = vmatprep.subr.bf16.mxu0 %v2090_v29 }
  0x54   : > { %1949 = vmatprep.subr.bf16.mxu1 %v2090_v29 }
  0x56   : > { %1929 = vmatpush3.bf16.msra.mxu0 %v2090_v29 }
  0x57   : > { %1957 = vmatpush3.bf16.msra.mxu1 %v2090_v29  ;;  %1930 = vmatprep.subr.bf16.mxu0 %v2097_v32 }
  0x58   : > { %1249 = vmatmul.mubr.bf16.gmra.mrb[24].mxu0 %v2095_v30  ;;  %1950 = vmatprep.subr.bf16.mxu1 %v2097_v32 }
  0x59   : > { %1314 = vmatmul.mubr.bf16.gmra.mrb[24].mxu1 %v2096_v31  ;;  %1256 = vmatprep.mubr.bf16.mxu0 %v2099_v33 }
  0x5a   : > { %1931 = vmatpush3.bf16.msra.mxu0 %v2097_v32  ;;  %1321 = vmatprep.mubr.bf16.mxu1 %v2101_v34 }
  0x5b   : > { %1958 = vmatpush3.bf16.msra.mxu1 %v2097_v32  ;;  %1932 = vmatprep.subr.bf16.mxu0 %v2098_v35 }
  0x5c   : > { %1951 = vmatprep.subr.bf16.mxu1 %v2098_v35 }
  0x5e   : > { %1933 = vmatpush3.bf16.msra.mxu0 %v2098_v35 }
  0x5f   : > { %1959 = vmatpush3.bf16.msra.mxu1 %v2098_v35  ;;  %1934 = vmatprep.subr.bf16.mxu0 %v2105_v37 }
  0x60   : > { %1257 = vmatmul.mubr.bf16.gmra.mrb[28].mxu0 %v2103_v36  ;;  %1952 = vmatprep.subr.bf16.mxu1 %v2105_v37 }
  0x61   : > { %1322 = vmatmul.mubr.bf16.gmra.mrb[28].mxu1 %v2104_v38  ;;  %1938 = vmatprep.mubr.bf16.mxu0 %v2107_v39 }
  0x62   : > { %1935 = vmatpush3.bf16.msra.mxu0 %v2105_v37  ;;  %1942 = vmatprep.mubr.bf16.mxu1 %v2108_v40 }
  0x63   : > { %1960 = vmatpush3.bf16.msra.mxu1 %v2105_v37  ;;  %1936 = vmatprep.subr.bf16.mxu0 %v2106_v41 }
  0x64   : > { %1953 = vmatprep.subr.bf16.mxu1 %v2106_v41 }
  0x66   : > { %1937 = vmatpush3.bf16.msra.mxu0 %v2106_v41 }
  0x67   : > { %1961 = vmatpush3.bf16.msra.mxu1 %v2106_v41 }
  0x69   : > { %1939 = vmatmul.mubr.bf16.vlgmr.msra.gmra.mrb[32].mxu0 %v2109_v42 }
  0x6a   : > { %1943 = vmatmul.mubr.bf16.vlgmr.msra.gmra.mrb[32].mxu1 %v2110_v43 }
  0xfb   : > { %v1766_v44 = vpop.f32.mrb[0].mxu0 }
  0xfc   : > { %v1806_v45 = vpop.f32.mrb[0].mxu1  ;;  %v1767_v46 = vpop.f32.mrb[1].mxu0 }
  0xfd   : > { %v1768_v47 = vadd.f32 %v1767_v46, %v1766_v44  ;;  %v1807_v48 = vpop.f32.mrb[1].mxu1  ;;  %v1769_v49 = vpop.f32.mrb[2].mxu0 }
  0xfe   : > { %v1808_v50 = vadd.f32 %v1807_v48, %v1806_v45  ;;  %v1809_v51 = vpop.f32.mrb[2].mxu1  ;;  %v1770_v52 = vpop.f32.mrb[3].mxu0 }
  0xff   : > { %v1771_v53 = vadd.f32 %v1770_v52, %v1769_v49  ;;  %v1810_v54 = vpop.f32.mrb[3].mxu1 }
 0x100   : > { %v1170_v55 = vadd.f32 %v1808_v50, %v1768_v47  ;;  %v1811_v56 = vadd.f32 %v1810_v54, %v1809_v51 }
 0x102   : > { %v1173_v57 = vadd.f32 %v1811_v56, %v1771_v53 }
 0x103   : > { %v1772_v58 = vpop.f32.mrb[4].mxu0 }
 0x104   : > { %v1812_v59 = vpop.f32.mrb[4].mxu1  ;;  %v1773_v60 = vpop.f32.mrb[5].mxu0 }
 0x105   : > { %v1774_v61 = vadd.f32 %v1773_v60, %v1772_v58  ;;  %v1813_v62 = vpop.f32.mrb[5].mxu1  ;;  %v1775_v63 = vpop.f32.mrb[6].mxu0 }
 0x106   : > { %v1814_v0 = vadd.f32 %v1813_v62, %v1812_v59  ;;  %v1815_v1 = vpop.f32.mrb[6].mxu1  ;;  %v1776_v2 = vpop.f32.mrb[7].mxu0 }
 0x107   : > { %v1777_v3 = vadd.f32 %v1776_v2, %v1775_v63  ;;  %v1816_v4 = vpop.f32.mrb[7].mxu1 }
 0x108   : > { %v1178_v5 = vadd.f32 %v1814_v0, %v1774_v61  ;;  %v1817_v6 = vadd.f32 %v1816_v4, %v1815_v1 }
 0x10a   : > { %v1181_v7 = vadd.f32 %v1817_v6, %v1777_v3 }
 0x10b   : > { %v1778_v8 = vpop.f32.mrb[8].mxu0 }
 0x10c   : > { %v1818_v9 = vpop.f32.mrb[8].mxu1  ;;  %v1779_v10 = vpop.f32.mrb[9].mxu0 }
 0x10d   : > { %v1780_v11 = vadd.f32 %v1779_v10, %v1778_v8  ;;  %v1819_v12 = vpop.f32.mrb[9].mxu1  ;;  %v1781_v13 = vpop.f32.mrb[10].mxu0 }
 0x10e   : > { %v1820_v14 = vadd.f32 %v1819_v12, %v1818_v9  ;;  %v1821_v15 = vpop.f32.mrb[10].mxu1  ;;  %v1782_v16 = vpop.f32.mrb[11].mxu0 }
 0x10f   : > { %v1783_v17 = vadd.f32 %v1782_v16, %v1781_v13  ;;  %v1822_v18 = vpop.f32.mrb[11].mxu1 }
 0x110   : > { %v1186_v19 = vadd.f32 %v1820_v14, %v1780_v11  ;;  %v1823_v20 = vadd.f32 %v1822_v18, %v1821_v15 }
 0x112   : > { %v1189_v21 = vadd.f32 %v1823_v20, %v1783_v17 }
 0x113   : > { %v1784_v22 = vpop.f32.mrb[12].mxu0 }
 0x114   : > { %v1824_v23 = vpop.f32.mrb[12].mxu1  ;;  %v1785_v24 = vpop.f32.mrb[13].mxu0 }
 0x115   : > { %v1825_v25 = vpop.f32.mrb[13].mxu1  ;;  %v1786_v26 = vadd.f32 %v1785_v24, %v1784_v22  ;;  %v1787_v28 = vpop.f32.mrb[14].mxu0 }
 0x116   : > { %v1826_v27 = vadd.f32 %v1825_v25, %v1824_v23  ;;  %v1827_v29 = vpop.f32.mrb[14].mxu1  ;;  %v1788_v30 = vpop.f32.mrb[15].mxu0 }
 0x117   : > { %v1828_v31 = vpop.f32.mrb[15].mxu1  ;;  %v1789_v33 = vadd.f32 %v1788_v30, %v1787_v28 }
 0x118   : > { %v1194_v32 = vadd.f32 %v1826_v27, %v1786_v26  ;;  %v1829_v34 = vadd.f32 %v1828_v31, %v1827_v29 }
 0x11a   : > { %v1197_v35 = vadd.f32 %v1829_v34, %v1789_v33 }
 0x11b   : > { %v1846_v36 = vpop.f32.mrb[16].mxu0 }
 0x11c   : > { %v1847_v37 = vpop.f32.mrb[17].mxu0  ;;  %v1886_v38 = vpop.f32.mrb[16].mxu1 }
 0x11d   : > { %v1848_v39 = vadd.f32 %v1847_v37, %v1846_v36  ;;  %v1849_v40 = vpop.f32.mrb[18].mxu0  ;;  %v1887_v41 = vpop.f32.mrb[17].mxu1 }
 0x11e   : > { %v1850_v42 = vpop.f32.mrb[19].mxu0  ;;  %v1888_v44 = vadd.f32 %v1887_v41, %v1886_v38  ;;  %v1889_v45 = vpop.f32.mrb[18].mxu1 }
 0x11f   : > { %v1235_v43 = vadd.f32 %v1848_v39, %v1170_v55  ;;  %v1851_v46 = vadd.f32 %v1850_v42, %v1849_v40  ;;  %v1890_v47 = vpop.f32.mrb[19].mxu1  ;;  %v1707_v39 = vld [vmem:[%s2465_s2] ss:$0 sm:$0xff] }
 0x120   : > { %v1891_v49 = vadd.f32 %v1890_v47, %v1889_v45 }
 0x121   : > { %v1238_v48 = vadd.f32 %v1851_v46, %v1173_v57  ;;  %v1300_v50 = vadd.f32 %v1888_v44, %v1235_v43 }
 0x123   : > { %v1852_v51 = vpop.f32.mrb[20].mxu0  ;;  %v2441_v52 = vadd.f32 %v1891_v49, %v1238_v48 }
 0x124   : > { %v1853_v53 = vpop.f32.mrb[21].mxu0  ;;  %v1892_v54 = vpop.f32.mrb[20].mxu1 }
 0x125   : > { %v1854_v56 = vadd.f32 %v1853_v53, %v1852_v51  ;;  %v1855_v58 = vpop.f32.mrb[22].mxu0  ;;  %v1893_v59 = vpop.f32.mrb[21].mxu1 }
 0x126   : > { %v1856_v60 = vpop.f32.mrb[23].mxu0  ;;  %v1894_v62 = vadd.f32 %v1893_v59, %v1892_v54  ;;  %v1895_v63 = vpop.f32.mrb[22].mxu1 }
 0x127   : > { %v1243_v61 = vadd.f32 %v1854_v56, %v1178_v5  ;;  %v1857_v55 = vadd.f32 %v1856_v60, %v1855_v58  ;;  %v1896_v0 = vpop.f32.mrb[23].mxu1 }
 0x128   : > { %v1897_v2 = vadd.f32 %v1896_v0, %v1895_v63 }
 0x129   : > { %v1246_v1 = vadd.f32 %v1857_v55, %v1181_v7  ;;  %v1308_v3 = vadd.f32 %v1894_v62, %v1243_v61 }
 0x12b   : > { %v1858_v57 = vpop.f32.mrb[24].mxu0  ;;  %v1311_v4 = vadd.f32 %v1897_v2, %v1246_v1 }
 0x12c   : > { %v1859_v6 = vpop.f32.mrb[25].mxu0  ;;  %v1898_v8 = vpop.f32.mrb[24].mxu1 }
 0x12d   : > { %v1860_v9 = vadd.f32 %v1859_v6, %v1858_v57  ;;  %v1861_v10 = vpop.f32.mrb[26].mxu0  ;;  %v1899_v11 = vpop.f32.mrb[25].mxu1 }
 0x12e   : > { %v1862_v12 = vpop.f32.mrb[27].mxu0  ;;  %v1900_v14 = vadd.f32 %v1899_v11, %v1898_v8  ;;  %v1901_v15 = vpop.f32.mrb[26].mxu1 }
 0x12f   : > { %v1251_v13 = vadd.f32 %v1860_v9, %v1186_v19  ;;  %v1863_v16 = vadd.f32 %v1862_v12, %v1861_v10  ;;  %v1902_v5 = vpop.f32.mrb[27].mxu1 }
 0x130   : > { %v1903_v18 = vadd.f32 %v1902_v5, %v1901_v15 }
 0x131   : > { %v1254_v17 = vadd.f32 %v1863_v16, %v1189_v21  ;;  %v1316_v20 = vadd.f32 %v1900_v14, %v1251_v13 }
 0x133   : > { %v1864_v22 = vpop.f32.mrb[28].mxu0  ;;  %v1319_v7 = vadd.f32 %v1903_v18, %v1254_v17 }
 0x134   : > { %v1865_v23 = vpop.f32.mrb[29].mxu0  ;;  %v1904_v24 = vpop.f32.mrb[28].mxu1 }
 0x135   : > { %v1866_v25 = vadd.f32 %v1865_v23, %v1864_v22  ;;  %v1867_v26 = vpop.f32.mrb[30].mxu0  ;;  %v1905_v27 = vpop.f32.mrb[29].mxu1 }
 0x136   : > { %v1868_v28 = vpop.f32.mrb[31].mxu0  ;;  %v1906_v30 = vadd.f32 %v1905_v27, %v1904_v24  ;;  %v1907_v31 = vpop.f32.mrb[30].mxu1 }
 0x137   : > { %v1259_v29 = vadd.f32 %v1866_v25, %v1194_v32  ;;  %v1869_v33 = vadd.f32 %v1868_v28, %v1867_v26  ;;  %v1908_v19 = vpop.f32.mrb[31].mxu1  ;;  %v1708_v32 = vld [vmem:[%s2466_s3] ss:$0 sm:$0xff] }
 0x138   : > { %v1909_v36 = vadd.f32 %v1908_v19, %v1907_v31 }
 0x139   : > { %v1262_v34 = vadd.f32 %v1869_v33, %v1197_v35  ;;  %v1324_v37 = vadd.f32 %v1906_v30, %v1259_v29 }
 0x13b   : > { %v1327_v38 = vadd.f32 %v1909_v36, %v1262_v34 }
 0x13c   : > { %v1940_v21 = vpop.f32.mrb[32].mxu0 }
 0x13d   : > { %v1373_v40 = vadd.f32 %v1940_v21, %v1308_v3  ;;  %v1944_v41 = vpop.f32.mrb[32].mxu1  ;;  %v1364_v42 = vpop.f32.mrb[33].mxu0 }
 0x13e   : > { %v1389_v43 = vadd.f32 %v1944_v41, %v1324_v37  ;;  %v1365_v44 = vadd.f32 %v1364_v42, %v1300_v50  ;;  %v1380_v45 = vpop.f32.mrb[33].mxu1  ;;  %v1941_v46 = vpop.f32.mrb[34].mxu0 }
 0x13f   : > { %v1404_v35 = vmul.f32 %v1707_v39, %v1373_v40  ;;  %v1381_v47 = vadd.f32 %v1380_v45, %v1316_v20  ;;  %v1376_v48 = vadd.f32 %v1941_v46, %v1311_v4  ;;  %v1945_v49 = vpop.f32.mrb[34].mxu1  ;;  %v1367_v51 = vpop.f32.mrb[35].mxu0 }
 0x140   : > { %v1408_v53 = vmul.f32 %v1707_v39, %v1389_v43  ;;  %v1402_v54 = vmul.f32 %v1707_v39, %v1365_v44  ;;  %v1392_v56 = vadd.f32 %v1945_v49, %v1327_v38  ;;  %v1368_v58 = vadd.f32 %v1367_v51, %v2441_v52  ;;  %v1383_v59 = vpop.f32.mrb[35].mxu1 }
 0x141   : > { %v1419_v60 = vadd.f32 %v1708_v32, %v1404_v35  ;;  %v1406_v61 = vmul.f32 %v1707_v39, %v1381_v47  ;;  %v1405_v62 = vmul.f32 %v1707_v39, %v1376_v48  ;;  %v1384_v63 = vadd.f32 %v1383_v59, %v1319_v7 }
 0x142   : > { %v1423_v55 = vadd.f32 %v1708_v32, %v1408_v53  ;;  %v1417_v50 = vadd.f32 %v1708_v32, %v1402_v54  ;;  %v1409_v0 = vmul.f32 %v1707_v39, %v1392_v56  ;;  %v1403_v1 = vmul.f32 %v1707_v39, %v1368_v58 }
 0x143   : > { %v1421_v2 = vadd.f32 %v1708_v32, %v1406_v61  ;;  %v1420_v3 = vadd.f32 %v1708_v32, %v1405_v62  ;;  %v1407_v57 = vmul.f32 %v1707_v39, %v1384_v63  ;;  %v1427_v8 = vmax.f32 %v1419_v60, 0.0 }
 0x144   : > { %v1424_v4 = vadd.f32 %v1708_v32, %v1409_v0  ;;  %v1418_v6 = vadd.f32 %v1708_v32, %v1403_v1  ;;  %v1431_v11 = vmax.f32 %v1423_v55, 0.0  ;;  %v1425_v52 = vmax.f32 %v1417_v50, 0.0 }
 0x145   : > { %v1428_v9 = vmax.f32 %v1420_v3, 0.0  ;;  %v1422_v10 = vadd.f32 %v1708_v32, %v1407_v57  ;;  %v1429_v14 = vmax.f32 %v1421_v2, 0.0 }
 0x146   : > { %v1432_v12 = vmax.f32 %v1424_v4, 0.0  ;;  %v1426_v13 = vmax.f32 %v1418_v6, 0.0 }
 0x147   : > { %v1735_v15 = vpack.c.bf16 %v1428_v9, %v1427_v8  ;;  %v1430_v16 = vmax.f32 %v1422_v10, 0.0 }
 0x148   : > { %v1745_v5 = vpack.c.bf16 %v1432_v12, %v1431_v11  ;;  %v1730_v17 = vpack.c.bf16 %v1426_v13, %v1425_v52 }
 0x149   : > { %1747 = vst [vmem:[%s267_s23 + $0x8] sm:$0xff] %v1735_v15   ;;  %v1740_v18 = vpack.c.bf16 %v1430_v16, %v1429_v14 }
 0x14a   : > { %1749 = vst [vmem:[%s267_s23 + $0x18] sm:$0xff] %v1745_v5   ;;  %1731 = vst [vmem:[%s267_s23] sm:$0xff] %v1730_v17  }
 0x14b   : > { %1748 = vst [vmem:[%s267_s23 + $0x10] sm:$0xff] %v1740_v18  }
 0x14c PF: > { %s14_s17 = sadd.s32 1, %s2133_s17   ;;  %s2468_s15 = smov %s2129_s16 }
 0x14d   : > { %p11_p5 = scmp.ge.s32.totalorder %s14_s17, 4   ;;  %s2469_s16 = smov %s2471_s18 }
 0x14f   :  { %13 = sbr.rel (!%p11_p5) target bundleno = 2 (0x2), region = 75 }

// kernel: basic_block_forward.4
= control target key start
LH: loop header
LB: loop body
LE: loop exit
PB: predicated region body
PF: predicated region fallthrough
CT: control target
= control target key end

     0   :  { %s816_s15 = smov 0   ;;  %s818_s16 = smov 0   ;;  %s892_s0 = inlined_call_operand.vmem [shape: bf16[128,128], index: 0, kind: input, shape index: {}]   ;;  %s893_s1 = inlined_call_operand.vmem [shape: bf16[128,128], index: 1, kind: input, shape index: {}]   ;;  %s894_s2 = inlined_call_operand.vmem [shape: f32[1,128], index: 2, kind: input, shape index: {}]   ;;  %s895_s3 = inlined_call_operand.vmem [shape: f32[1,128], index: 3, kind: input, shape index: {}]   ;;  %s896_s4 = inlined_call_operand.vmem [shape: bf16[128,128], index: 4, kind: output, shape index: {}]  }
   0x1   :  { %s820_s17 = smov 0  }
   0x2 LB: > { %s26_s18 = sadd.s32 1, %s785_s16  ;;  %p619_p0 = scmp.ge.s32.totalorder %s789_s17, 1  ;;  %s789_s17 = sphi %s820_s17, %s14_s17   ;;  %s785_s16 = sphi %s818_s16, %s898_s16   ;;  %s781_s15 = sphi %s816_s15, %s897_s15  }
   0x3   : > { %p28_p1 = scmp.ge.s32.totalorder %s26_s18, 2  ;;  %p202_p2 = scmp.lt.s32.totalorder %s789_s17, 3 }
   0x5   : > { %s900_s18 = smov (%p28_p1, %s26_s18), 0  ;;  %p203_p3 = pnand %p619_p0, %p202_p2 }
   0x6   : > { %v755_v0 = vld [vmem:[%s893_s1] sm:$0xff] (!%p203_p3)   ;;  %s620_s21 = sshll.u32 (!%p203_p3), %s781_s15, 3  ;;  %v756_v1 = vld [vmem:[%s893_s1 + $0x8] sm:$0xff] (!%p203_p3)   ;;  %v757_v2 = vld [vmem:[%s893_s1 + $0x10] sm:$0xff] (!%p203_p3)  }
   0x7   : > { %206 = sbr.rel (%p203_p3) target bundleno = 261 (0x105), region = 36  ;;  %p242_p4 = scmp.lt.s32.totalorder (!%p203_p3), %s620_s21, 15  ;;  %691 = vmatprep.subr.bf16.mxu0 (!%p203_p3), %v755_v0  ;;  %715 = vmatprep.subr.bf16.mxu1 (!%p203_p3), %v755_v0  ;;  %v758_v3 = vld [vmem:[%s893_s1 + $0x18] sm:$0xff] (!%p203_p3)   ;;  %v759_v6 = vld [vmem:[%s893_s1 + $0x20] sm:$0xff] (!%p203_p3)   ;;  %v760_v7 = vld [vmem:[%s893_s1 + $0x28] sm:$0xff] (!%p203_p3)  }
   0x8   : > { %692 = vmatpush3.bf16.msra.mxu0 (!%p203_p3), %v755_v0  ;;  %723 = vmatpush3.bf16.msra.mxu1 (!%p203_p3), %v755_v0  ;;  %v761_v8 = vld [vmem:[%s893_s1 + $0x30] sm:$0xff] (!%p203_p3)   ;;  %v762_v9 = vld [vmem:[%s893_s1 + $0x38] sm:$0xff] (!%p203_p3)   ;;  %v636_v12 = vld [vmem:[%s894_s2] ss:$0 sm:$0xff] (!%p203_p3) }
   0x9   : > { %693 = vmatprep.subr.bf16.mxu0 (!%p203_p3), %v756_v1  ;;  %716 = vmatprep.subr.bf16.mxu1 (!%p203_p3), %v756_v1  ;;  %v637_v19 = vld [vmem:[%s895_s3] ss:$0 sm:$0xff] (!%p203_p3) }
   0xc   : > { %694 = vmatpush3.bf16.msra.mxu0 (!%p203_p3), %v756_v1  ;;  %724 = vmatpush3.bf16.msra.mxu1 (!%p203_p3), %v756_v1 }
   0xd   : > { %695 = vmatprep.subr.bf16.mxu0 (!%p203_p3), %v757_v2  ;;  %717 = vmatprep.subr.bf16.mxu1 (!%p203_p3), %v757_v2 }
   0xe   : > { %s902_s21 = smov (!%p242_p4, %s620_s21), 15 }
   0xf   : > { %s621_s26 = sshll.u32 %s902_s21, 2 }
  0x10   : > { %s851_s29 = scalar_lea.vmem %s892_s0, %s621_s26  ;;  %696 = vmatpush3.bf16.msra.mxu0 %v757_v2  ;;  %725 = vmatpush3.bf16.msra.mxu1 %v757_v2  ;;  %s264_s24 = scalar_lea.vmem %s896_s4, %s621_s26 }
  0x11   : > { %v763_v4 = vld [vmem:[%s851_s29] sm:$0xff]   ;;  %v764_v5 = vld [vmem:[%s851_s29 + $0x10] sm:$0xff]   ;;  %697 = vmatprep.subr.bf16.mxu0 %v758_v3  ;;  %718 = vmatprep.subr.bf16.mxu1 %v758_v3  ;;  %v765_v10 = vld [vmem:[%s851_s29 + $0x8] sm:$0xff]  }
  0x12   : > { %707 = vmatprep.mubr.bf16.mxu0 %v763_v4  ;;  %711 = vmatprep.mubr.bf16.mxu1 %v764_v5  ;;  %v766_v11 = vld [vmem:[%s851_s29 + $0x18] sm:$0xff]  }
  0x14   : > { %698 = vmatpush3.bf16.msra.mxu0 %v758_v3  ;;  %726 = vmatpush3.bf16.msra.mxu1 %v758_v3 }
  0x15   : > { %699 = vmatprep.subr.bf16.mxu0 %v759_v6  ;;  %719 = vmatprep.subr.bf16.mxu1 %v759_v6 }
  0x18   : > { %700 = vmatpush3.bf16.msra.mxu0 %v759_v6  ;;  %727 = vmatpush3.bf16.msra.mxu1 %v759_v6 }
  0x19   : > { %701 = vmatprep.subr.bf16.mxu0 %v760_v7  ;;  %720 = vmatprep.subr.bf16.mxu1 %v760_v7 }
  0x1c   : > { %702 = vmatpush3.bf16.msra.mxu0 %v760_v7  ;;  %728 = vmatpush3.bf16.msra.mxu1 %v760_v7 }
  0x1d   : > { %703 = vmatprep.subr.bf16.mxu0 %v761_v8  ;;  %721 = vmatprep.subr.bf16.mxu1 %v761_v8 }
  0x20   : > { %704 = vmatpush3.bf16.msra.mxu0 %v761_v8  ;;  %729 = vmatpush3.bf16.msra.mxu1 %v761_v8 }
  0x21   : > { %705 = vmatprep.subr.bf16.mxu0 %v762_v9  ;;  %722 = vmatprep.subr.bf16.mxu1 %v762_v9 }
  0x24   : > { %706 = vmatpush3.bf16.msra.mxu0 %v762_v9  ;;  %730 = vmatpush3.bf16.msra.mxu1 %v762_v9 }
  0x27   : > { %708 = vmatmul.mubr.bf16.vlgmr.msra.gmra.mrb[0].mxu0 %v765_v10  ;;  %712 = vmatmul.mubr.bf16.vlgmr.msra.gmra.mrb[0].mxu1 %v766_v11 }
  0xfa   : > { %v709_v13 = vpop.f32.mrb[0].mxu0  ;;  %v713_v14 = vpop.f32.mrb[0].mxu1 }
  0xfb   : > { %v437_v15 = vmul.f32 %v709_v13, %v636_v12  ;;  %v441_v16 = vmul.f32 %v713_v14, %v636_v12  ;;  %v397_v17 = vpop.f32.mrb[1].mxu0  ;;  %v413_v18 = vpop.f32.mrb[1].mxu1 }
  0xfc   : > { %v435_v20 = vmul.f32 %v636_v12, %v397_v17  ;;  %v439_v21 = vmul.f32 %v636_v12, %v413_v18  ;;  %v710_v22 = vpop.f32.mrb[2].mxu0  ;;  %v714_v23 = vpop.f32.mrb[2].mxu1 }
  0xfd   : > { %v438_v24 = vmul.f32 %v710_v22, %v636_v12  ;;  %v442_v25 = vmul.f32 %v714_v23, %v636_v12  ;;  %v400_v26 = vpop.f32.mrb[3].mxu0  ;;  %v416_v27 = vpop.f32.mrb[3].mxu1  ;;  %v452_v30 = vadd.f32 %v637_v19, %v437_v15  ;;  %v456_v31 = vadd.f32 %v637_v19, %v441_v16 }
  0xfe   : > { %v436_v28 = vmul.f32 %v636_v12, %v400_v26  ;;  %v440_v29 = vmul.f32 %v636_v12, %v416_v27  ;;  %v450_v34 = vadd.f32 %v637_v19, %v435_v20  ;;  %v454_v35 = vadd.f32 %v637_v19, %v439_v21 }
  0xff   : > { %v453_v32 = vadd.f32 %v637_v19, %v438_v24  ;;  %v457_v33 = vadd.f32 %v637_v19, %v442_v25 }
 0x100   : > { %v451_v36 = vadd.f32 %v637_v19, %v436_v28  ;;  %v455_v37 = vadd.f32 %v637_v19, %v440_v29 }
 0x101   : > { %v664_v38 = vpack.c.bf16 %v453_v32, %v452_v30  ;;  %v674_v39 = vpack.c.bf16 %v457_v33, %v456_v31 }
 0x102   : > { %v659_v40 = vpack.c.bf16 %v451_v36, %v450_v34  ;;  %v669_v41 = vpack.c.bf16 %v455_v37, %v454_v35 }
 0x103   : > { %676 = vst [vmem:[%s264_s24 + $0x8] sm:$0xff] %v664_v38   ;;  %678 = vst [vmem:[%s264_s24 + $0x18] sm:$0xff] %v674_v39  }
 0x104   : > { %660 = vst [vmem:[%s264_s24] sm:$0xff] %v659_v40   ;;  %677 = vst [vmem:[%s264_s24 + $0x10] sm:$0xff] %v669_v41  }
 0x105 PF: > { %s14_s17 = sadd.s32 1, %s789_s17   ;;  %s897_s15 = smov %s785_s16 }
 0x106   : > { %p11_p5 = scmp.ge.s32.totalorder %s14_s17, 4   ;;  %s898_s16 = smov %s900_s18 }
 0x108   :  { %13 = sbr.rel (!%p11_p5) target bundleno = 2 (0x2), region = 75 }

// kernel: basic_block_forward.5
= control target key start
LH: loop header
LB: loop body
LE: loop exit
PB: predicated region body
PF: predicated region fallthrough
CT: control target
= control target key end

     0   :  { %s3277_s18 = smov 0   ;;  %s3859_s0 = inlined_call_operand.vmem [shape: bf16[2,10,10,128], index: 0, kind: input, shape index: {}]   ;;  %s3860_s1 = inlined_call_operand.vmem [shape: bf16[9,128,128], index: 1, kind: input, shape index: {}]   ;;  %s3861_s2 = inlined_call_operand.vmem [shape: f32[1,128], index: 2, kind: input, shape index: {}]   ;;  %s3862_s3 = inlined_call_operand.vmem [shape: f32[1,128], index: 3, kind: input, shape index: {}]   ;;  %s3863_s4 = inlined_call_operand.vmem [shape: bf16[2,8,8,128], index: 4, kind: input, shape index: {}]   ;;  %s3864_s5 = inlined_call_operand.vmem [shape: bf16[2,8,8,128], index: 5, kind: output, shape index: {}]  }
   0x1 LB: > { %s2360_s19 = sadd.s32 4294967295, %s3245_s18   ;;  %p2364_p0 = scmp.ge.s32.totalorder %s3245_s18, 1  ;;  %s3245_s18 = sphi %s3277_s18, %s15_s18  }
   0x2   : > { %p197_p1 = scmp.lt.s32.totalorder %s3245_s18, 3 }
   0x4   : > { %p198_p2 = pnand %p2364_p0, %p197_p1 }
   0x5   : > { %v3155_v0 = vld [vmem:[%s3860_s1 + $0x40] sm:$0xff] (!%p198_p2)   ;;  %p230_p3 = scmp.lt.s32.totalorder (!%p198_p2), %s2360_s19, 1  ;;  %v3157_v2 = vld [vmem:[%s3860_s1 + $0x48] sm:$0xff] (!%p198_p2)   ;;  %v3159_v4 = vld [vmem:[%s3860_s1 + $0x50] sm:$0xff] (!%p198_p2)   ;;  %vm278_vm0 = vsmask.f32 (!%p198_p2), 3328 }
   0x6   : > { %201 = sbr.rel (%p198_p2) target bundleno = 400 (0x190), region = 40  ;;  %v3156_v1 = vld [vmem:[%s3860_s1 + $0x100] sm:$0xff] (!%p198_p2)   ;;  %2850 = vmatprep.subr.bf16.mxu1 (!%p198_p2), %v3155_v0  ;;  %v3158_v3 = vld [vmem:[%s3860_s1 + $0x108] sm:$0xff] (!%p198_p2)   ;;  %v3160_v5 = vld [vmem:[%s3860_s1 + $0x110] sm:$0xff] (!%p198_p2)   ;;  %vm279_vm1 = vsmask.f32 (!%p198_p2), 7440 }
   0x7   : > { %2946 = vmatprep.subr.bf16.mxu0 (!%p198_p2), %v3156_v1  ;;  %2851 = vmatpush3.bf16.msra.mxu1 (!%p198_p2), %v3155_v0  ;;  %v3161_v6 = vld [vmem:[%s3860_s1 + $0x58] sm:$0xff] (!%p198_p2)   ;;  %v3163_v8 = vld [vmem:[%s3860_s1 + $0x60] sm:$0xff] (!%p198_p2)   ;;  %v3165_v10 = vld [vmem:[%s3860_s1 + $0x68] sm:$0xff] (!%p198_p2)   ;;  %vm700_vm3 = vcmask (!%p198_p2), 1042432   ;;  %vm701_vm4 = vcmask (!%p198_p2), 1046532  }
   0x8   : > { %2947 = vmatpush3.bf16.msra.mxu0 (!%p198_p2), %v3156_v1  ;;  %2852 = vmatprep.subr.bf16.mxu1 (!%p198_p2), %v3157_v2  ;;  %v3162_v7 = vld [vmem:[%s3860_s1 + $0x118] sm:$0xff] (!%p198_p2)   ;;  %v3164_v9 = vld [vmem:[%s3860_s1 + $0x120] sm:$0xff] (!%p198_p2)   ;;  %v3166_v14 = vld [vmem:[%s3860_s1 + $0x128] sm:$0xff] (!%p198_p2)  }
   0x9   : > { %2948 = vmatprep.subr.bf16.mxu0 (!%p198_p2), %v3158_v3  ;;  %v3167_v22 = vld [vmem:[%s3860_s1 + $0x70] sm:$0xff] (!%p198_p2)   ;;  %v3169_v37 = vld [vmem:[%s3860_s1 + $0x78] sm:$0xff] (!%p198_p2)   ;;  %vm3366_vm2 = vmor (!%p198_p2), %vm278_vm0, %vm279_vm1 }
   0xa   : > { %v3168_v23 = vld [vmem:[%s3860_s1 + $0x130] sm:$0xff] (!%p198_p2)   ;;  %v3170_v47 = vld [vmem:[%s3860_s1 + $0x138] sm:$0xff] (!%p198_p2)   ;;  %v3171_v63 = vld [vmem:[%s3860_s1] sm:$0xff] (!%p198_p2)  }
   0xb   : > { %2853 = vmatpush3.bf16.msra.mxu1 (!%p198_p2), %v3157_v2  ;;  %v3398_v1 = vld [vmem:[%s3860_s1 + $0x140] sm:$0xff] (!%p198_p2)   ;;  %vm3540_vm5 = vmor (!%p198_p2), %vm700_vm3, %vm701_vm4 }
   0xc   : > { %2949 = vmatpush3.bf16.msra.mxu0 (!%p198_p2), %v3158_v3  ;;  %2854 = vmatprep.subr.bf16.mxu1 (!%p198_p2), %v3159_v4  ;;  %v3235_v38 = vld [vmem:[%s3860_s1 + $0x220] sm:$0xff] (!%p198_p2)  }
   0xd   : > { %s3870_s19 = smov (!%p230_p3, %s2360_s19), 1  ;;  %2950 = vmatprep.subr.bf16.mxu0 %v3160_v5 }
   0xe   : > { %s3146_s11 = smul.u32 80, %s3870_s19 }
   0xf   : > { %2855 = vmatpush3.bf16.msra.mxu1 %v3159_v4 }
  0x10   : > { %2951 = vmatpush3.bf16.msra.mxu0 %v3160_v5  ;;  %2856 = vmatprep.subr.bf16.mxu1 %v3161_v6  ;;  %s3321_s20 = scalar_lea.vmem %s3859_s0, %s3146_s11 }
  0x11   : > { %2952 = vmatprep.subr.bf16.mxu0 %v3162_v7  ;;  %v3327_v11 = vld [vmem:[%s3321_s20] sm:$0xf]  ;;  %v3330_v12 = vld [vmem:[%s3321_s20 + $0x8] sm:$0xf]  ;;  %v3333_v13 = vld [vmem:[%s3321_s20 + $0x4] sm:$0x1] }
  0x12   : > { %v3339_v15 = vld [vmem:[%s3321_s20 + $0xc] sm:$0x1]  ;;  %v282_v16 = vshrl.u32 %v3327_v11, 16  ;;  %v285_v17 = vshll.u32 %v3327_v11, 16  ;;  %v291_v18 = vshll.u32 %v3333_v13, 16  ;;  %v296_v19 = vshrl.u32 %v3330_v12, 16 }
  0x13   : > { %2857 = vmatpush3.bf16.msra.mxu1 %v3161_v6  ;;  %v299_v20 = vshll.u32 %v3330_v12, 16  ;;  %v305_v21 = vshll.u32 %v3339_v15, 16  ;;  %v2482_v30 = vld [vmem:[%s3321_s20 + $0x8] sm:$0xf]  ;;  %v3355_v31 = vld [vmem:[%s3321_s20 + $0xc] sm:$0x1] }
  0x14   : > { %2953 = vmatpush3.bf16.msra.mxu0 %v3162_v7  ;;  %2858 = vmatprep.subr.bf16.mxu1 %v3163_v8  ;;  %v284_v24 = vrot.slane %v282_v16, 4  ;;  %v287_v25 = vrot.slane %v285_v17, 5  ;;  %v293_v26 = vrot.slane %v291_v18, 5  ;;  %v298_v27 = vrot.slane %v296_v19, 4  ;;  %v2484_v33 = vld [vmem:[%s3321_s20 + $0x10] sm:$0xf] }
  0x15   : > { %2954 = vmatprep.subr.bf16.mxu0 %v3164_v9  ;;  %v301_v28 = vrot.slane %v299_v20, 5  ;;  %v307_v29 = vrot.slane %v305_v21, 5  ;;  %v3359_v34 = vld [vmem:[%s3321_s20 + $0x14] sm:$0x1]  ;;  %v1077_v35 = vshrl.u32 %v2482_v30, 16  ;;  %v1080_v36 = vshll.u32 %v2482_v30, 16 }
  0x16   : > { %v288_v32 = vor.u32 %v287_v25, %v284_v24  ;;  %v1086_v40 = vshll.u32 %v3355_v31, 16  ;;  %v1091_v41 = vshrl.u32 %v2484_v33, 16  ;;  %v1094_v42 = vshll.u32 %v2484_v33, 16  ;;  %v3376_v51 = vld [vmem:[%s3321_s20 + $0x10] sm:$0xf] }
  0x17   : > { %2859 = vmatpush3.bf16.msra.mxu1 %v3163_v8  ;;  %v302_v39 = vor.u32 %v301_v28, %v298_v27  ;;  %v1079_v44 = vrot.slane %v1077_v35, 4  ;;  %v1082_v45 = vrot.slane %v1080_v36, 5  ;;  %v1100_v46 = vshll.u32 %v3359_v34, 16  ;;  %v3381_v55 = vld [vmem:[%s3321_s20 + $0x18] sm:$0xf] }
  0x18   : > { %2955 = vmatpush3.bf16.msra.mxu0 %v3164_v9  ;;  %2860 = vmatprep.subr.bf16.mxu1 %v3165_v10  ;;  %v289_v43 = vrot.slane %v288_v32, 4  ;;  %v1093_v49 = vrot.slane %v1091_v41, 4  ;;  %v1096_v50 = vrot.slane %v1094_v42, 5  ;;  %v1088_v54 = vrot.slane %v1086_v40, 5  ;;  %v3384_v56 = vld [vmem:[%s3321_s20 + $0x14] sm:$0x1] }
  0x19   : > { %2956 = vmatprep.subr.bf16.mxu0 %v3166_v14  ;;  %v303_v48 = vrot.slane %v302_v39, 4  ;;  %v1083_v53 = vor.u32 %v1082_v45, %v1079_v44  ;;  %v1102_v59 = vrot.slane %v1100_v46, 5  ;;  %v3389_v60 = vld [vmem:[%s3321_s20 + $0x1c] sm:$0x1]  ;;  %v310_v61 = vshrl.u32 %v3376_v51, 16 }
  0x1a   : > { %v294_v52 = vsel %vm3366_vm2, %v289_v43, %v293_v26  ;;  %v1097_v58 = vor.u32 %v1096_v50, %v1093_v49  ;;  %v313_v2 = vshll.u32 %v3376_v51, 16  ;;  %v319_v3 = vshll.u32 %v3384_v56, 16  ;;  %v2486_v8 = vld [vmem:[%s3321_s20 + $0x18] sm:$0xf]  ;;  %v3409_v16 = vld [vmem:[%s3321_s20 + $0x1c] sm:$0x1] }
  0x1b   : > { %2861 = vmatpush3.bf16.msra.mxu1 %v3165_v10  ;;  %v308_v57 = vsel %vm3366_vm2, %v303_v48, %v307_v29  ;;  %v1084_v0 = vrot.slane %v1083_v53, 4  ;;  %v312_v5 = vrot.slane %v310_v61, 4  ;;  %v324_v6 = vshrl.u32 %v3381_v55, 16  ;;  %v2488_v17 = vld [vmem:[%s3321_s20 + $0x20] sm:$0xf]  ;;  %v3173_v43 = vld [vmem:[%s3860_s1 + $0x8] sm:$0xff]  }
  0x1c   : > { %2957 = vmatpush3.bf16.msra.mxu0 %v3166_v14  ;;  %2862 = vmatprep.subr.bf16.mxu1 %v3167_v22  ;;  %v2386_v62 = vcombine.low %v294_v52, %v308_v57  ;;  %v1098_v4 = vrot.slane %v1097_v58, 4  ;;  %v327_v7 = vshll.u32 %v3381_v55, 16  ;;  %v315_v10 = vrot.slane %v313_v2, 5  ;;  %v3415_v21 = vld [vmem:[%s3321_s20 + $0x24] sm:$0x1] }
  0x1d   : > { %2958 = vmatprep.subr.bf16.mxu0 %v3168_v23  ;;  %v1089_v9 = vsel %vm3366_vm2, %v1084_v0, %v1088_v54  ;;  %v333_v14 = vshll.u32 %v3389_v60, 16  ;;  %v326_v19 = vrot.slane %v324_v6, 4  ;;  %v321_v24 = vrot.slane %v319_v3, 5  ;;  %v3174_v54 = vld [vmem:[%s3860_s1 + $0x148] sm:$0xff]   ;;  %v3445_v0 = vld [vmem:[%s3321_s20 + $0x24] sm:$0x1] }
  0x1e   : > { %2866 = vmatprep.mubr.bf16.mxu1 %v2386_v62  ;;  %v1103_v18 = vsel %vm3366_vm2, %v1098_v4, %v1102_v59  ;;  %v329_v20 = vrot.slane %v327_v7, 5  ;;  %v1105_v27 = vshrl.u32 %v2486_v8, 16  ;;  %v1108_v28 = vshll.u32 %v2486_v8, 16  ;;  %v3175_v59 = vld [vmem:[%s3860_s1 + $0x10] sm:$0xff]   ;;  %v3439_v62 = vld [vmem:[%s3321_s20 + $0x20] sm:$0xf] }
  0x1f   : > { %2863 = vmatpush3.bf16.msra.mxu1 %v3167_v22  ;;  %v2514_v22 = vcombine.low %v1089_v9, %v1103_v18  ;;  %v335_v25 = vrot.slane %v333_v14, 5  ;;  %v1114_v29 = vshll.u32 %v3409_v16, 16  ;;  %v1119_v32 = vshrl.u32 %v2488_v17, 16  ;;  %v3448_v2 = vld [vmem:[%s3321_s20 + $0x2c] sm:$0x1]  ;;  %v3176_v9 = vld [vmem:[%s3860_s1 + $0x150] sm:$0xff]  }
  0x20   : > { %2959 = vmatpush3.bf16.msra.mxu0 %v3168_v23  ;;  %2864 = vmatprep.subr.bf16.mxu1 %v3169_v37  ;;  %v316_v23 = vor.u32 %v315_v10, %v312_v5  ;;  %v330_v26 = vor.u32 %v329_v20, %v326_v19  ;;  %v1122_v33 = vshll.u32 %v2488_v17, 16  ;;  %v1128_v35 = vshll.u32 %v3415_v21, 16  ;;  %v3177_v10 = vld [vmem:[%s3860_s1 + $0x18] sm:$0xff]  }
  0x21   : > { %2960 = vmatprep.subr.bf16.mxu0 %v3170_v47  ;;  %2962 = vmatprep.mubr.bf16.mxu0 %v2514_v22  ;;  %v1110_v39 = vrot.slane %v1108_v28, 5  ;;  %v1121_v41 = vrot.slane %v1119_v32, 4  ;;  %v1116_v46 = vrot.slane %v1114_v29, 5  ;;  %v1368_v57 = vrot.slane %v3355_v31, 5  ;;  %v3178_v29 = vld [vmem:[%s3860_s1 + $0x158] sm:$0xff]  }
  0x22   : > { %v317_v30 = vrot.slane %v316_v23, 4  ;;  %v331_v36 = vrot.slane %v330_v26, 4  ;;  %v1124_v42 = vrot.slane %v1122_v33, 5  ;;  %v338_v3 = vshrl.u32 %v3439_v62, 16  ;;  %v2490_v23 = vld [vmem:[%s3321_s20 + $0x28] sm:$0xf] }
  0x23   : > { %2865 = vmatpush3.bf16.msra.mxu1 %v3169_v37  ;;  %v1107_v37 = vrot.slane %v1105_v27, 4  ;;  %v341_v4 = vshll.u32 %v3439_v62, 16  ;;  %v347_v5 = vshll.u32 %v3445_v0, 16  ;;  %v361_v8 = vshll.u32 %v3448_v2, 16  ;;  %v3469_v26 = vld [vmem:[%s3321_s20 + $0x34] sm:$0x1] }
  0x24   : > { %2961 = vmatpush3.bf16.msra.mxu0 %v3170_v47  ;;  %2874 = vmatprep.subr.bf16.mxu1 %v3171_v63  ;;  %v322_v40 = vsel %vm3366_vm2, %v317_v30, %v321_v24  ;;  %v336_v44 = vsel %vm3366_vm2, %v331_v36, %v335_v25  ;;  %v1130_v47 = vrot.slane %v1128_v35, 5  ;;  %v1125_v49 = vor.u32 %v1124_v42, %v1121_v41  ;;  %v3465_v24 = vld [vmem:[%s3321_s20 + $0x2c] sm:$0x1]  ;;  %v2492_v25 = vld [vmem:[%s3321_s20 + $0x30] sm:$0xf]  ;;  %v3179_v30 = vld [vmem:[%s3860_s1 + $0x20] sm:$0xff]  }
  0x25   : > { %2970 = vmatprep.subr.bf16.mxu0 %v3398_v1  ;;  %v1111_v45 = vor.u32 %v1110_v39, %v1107_v37  ;;  %v2387_v48 = vcombine.low %v322_v40, %v336_v44  ;;  %v340_v14 = vrot.slane %v338_v3, 4  ;;  %v343_v17 = vrot.slane %v341_v4, 5 }
  0x26   : > { %v1126_v52 = vrot.slane %v1125_v49, 4  ;;  %v349_v18 = vrot.slane %v347_v5, 5  ;;  %v363_v22 = vrot.slane %v361_v8, 5  ;;  %v1133_v27 = vshrl.u32 %v2490_v23, 16  ;;  %v2494_v5 = vld [vmem:[%s3321_s20 + $0x38] sm:$0xf] }
  0x27   : > { %v1112_v50 = vrot.slane %v1111_v45, 4  ;;  %2867 = vmatmul.mubr.bf16.vlgmr.msra.gmra.mrb[0].mxu1 %v2387_v48  ;;  %v1136_v28 = vshll.u32 %v2490_v23, 16  ;;  %v1142_v33 = vshll.u32 %v3465_v24, 16  ;;  %v1147_v35 = vshrl.u32 %v2492_v25, 16 }
  0x28   : > { %2875 = vmatpush3.bf16.msra.mxu1 %v3171_v63  ;;  %v1131_v58 = vsel %vm3366_vm2, %v1126_v52, %v1130_v47  ;;  %v3442_v63 = vld [vmem:[%s3321_s20 + $0x28] sm:$0xf]  ;;  %v1150_v36 = vshll.u32 %v2492_v25, 16  ;;  %v1135_v39 = vrot.slane %v1133_v27, 4  ;;  %v1156_v41 = vshll.u32 %v3469_v26, 16 }
  0x29   : > { %v1117_v53 = vsel %vm3366_vm2, %v1112_v50, %v1116_v46  ;;  %2876 = vmatprep.subr.bf16.mxu1 %v3173_v43  ;;  %v352_v6 = vshrl.u32 %v3442_v63, 16  ;;  %v355_v7 = vshll.u32 %v3442_v63, 16  ;;  %v1138_v40 = vrot.slane %v1136_v28, 5  ;;  %v3480_v46 = vld [vmem:[%s3321_s20 + $0x30] sm:$0xf] }
  0x2a   : > { %v2515_v61 = vcombine.low %v1117_v53, %v1131_v58  ;;  %v1149_v44 = vrot.slane %v1147_v35, 4  ;;  %v1152_v45 = vrot.slane %v1150_v36, 5  ;;  %v1158_v49 = vrot.slane %v1156_v41, 5  ;;  %v3485_v50 = vld [vmem:[%s3321_s20 + $0x38] sm:$0xf] }
  0x2b   : > { %v354_v19 = vrot.slane %v352_v6, 4  ;;  %v357_v20 = vrot.slane %v355_v7, 5  ;;  %v1139_v48 = vor.u32 %v1138_v40, %v1135_v39  ;;  %v3488_v52 = vld [vmem:[%s3321_s20 + $0x34] sm:$0x1]  ;;  %v366_v53 = vshrl.u32 %v3480_v46, 16  ;;  %v3181_v6 = vld [vmem:[%s3860_s1 + $0x28] sm:$0xff]  }
  0x2c   : > { %2963 = vmatmul.mubr.bf16.vlgmr.msra.gmra.mrb[0].mxu0 %v2515_v61  ;;  %2877 = vmatpush3.bf16.msra.mxu1 %v3173_v43  ;;  %v1144_v43 = vrot.slane %v1142_v33, 5  ;;  %v3497_v61 = vld [vmem:[%s3321_s20 + $0x3c] sm:$0x1]  ;;  %v369_v3 = vshll.u32 %v3480_v46, 16  ;;  %v375_v4 = vshll.u32 %v3488_v52, 16  ;;  %v1161_v28 = vshrl.u32 %v2494_v5, 16 }
  0x2d   : > { %2971 = vmatpush3.bf16.msra.mxu0 %v3398_v1  ;;  %2878 = vmatprep.subr.bf16.mxu1 %v3175_v59  ;;  %v344_v1 = vor.u32 %v343_v17, %v340_v14  ;;  %v358_v32 = vor.u32 %v357_v20, %v354_v19  ;;  %v1140_v8 = vrot.slane %v1139_v48, 4  ;;  %v380_v14 = vshrl.u32 %v3485_v50, 16  ;;  %v3507_v17 = vld [vmem:[%s3321_s20 + $0x3c] sm:$0x1]  ;;  %v3515_v27 = vld [vmem:[%s3321_s20 + $0x44] sm:$0x1] }
  0x2e   : > { %2972 = vmatprep.subr.bf16.mxu0 %v3174_v54  ;;  %v371_v19 = vrot.slane %v369_v3, 5  ;;  %v377_v20 = vrot.slane %v375_v4, 5  ;;  %v389_v25 = vshll.u32 %v3497_v61, 16  ;;  %v1164_v36 = vshll.u32 %v2494_v5, 16 }
  0x2f   : > { %v345_v37 = vrot.slane %v344_v1, 4  ;;  %v359_v42 = vrot.slane %v358_v32, 4  ;;  %v1145_v23 = vsel %vm3366_vm2, %v1140_v8, %v1144_v43  ;;  %v382_v1 = vrot.slane %v380_v14, 4 }
  0x30   : > { %2879 = vmatpush3.bf16.msra.mxu1 %v3175_v59  ;;  %v1153_v59 = vor.u32 %v1152_v45, %v1149_v44  ;;  %v391_v40 = vrot.slane %v389_v25, 5  ;;  %v1163_v41 = vrot.slane %v1161_v28, 4  ;;  %v1166_v45 = vrot.slane %v1164_v36, 5  ;;  %v2528_v25 = vld [vmem:[%s3321_s20 + $0x18] sm:$0xe] }
  0x31   : > { %2973 = vmatpush3.bf16.msra.mxu0 %v3174_v54  ;;  %2880 = vmatprep.subr.bf16.mxu1 %v3177_v10  ;;  %v350_v47 = vsel %vm3366_vm2, %v345_v37, %v349_v18  ;;  %v3180_v54 = vld [vmem:[%s3860_s1 + $0x160] sm:$0xff]   ;;  %v364_v58 = vsel %vm3366_vm2, %v359_v42, %v363_v22  ;;  %v383_v22 = vshll.u32 %v3485_v50, 16  ;;  %v3183_v37 = vld [vmem:[%s3860_s1 + $0x30] sm:$0xff]   ;;  %v1170_v42 = vshll.u32 %v3507_v17, 16  ;;  %v3186_v28 = vld [vmem:[%s3860_s1 + $0x178] sm:$0xff]  }
  0x32   : > { %2974 = vmatprep.subr.bf16.mxu0 %v3176_v9  ;;  %v2388_v7 = vcombine.low %v350_v47, %v364_v58  ;;  %v1154_v18 = vrot.slane %v1153_v59, 4  ;;  %v1372_v47 = vrot.slane %v3359_v34, 5  ;;  %v1376_v48 = vrot.slane %v3409_v16, 5  ;;  %v3184_v58 = vld [vmem:[%s3860_s1 + $0x170] sm:$0xff]  }
  0x33   : > { %v385_v35 = vrot.slane %v383_v22, 5  ;;  %v1167_v4 = vor.u32 %v1166_v45, %v1163_v41  ;;  %v1172_v34 = vrot.slane %v1170_v42, 5  ;;  %v1380_v22 = vrot.slane %v3415_v21, 5  ;;  %v3189_v41 = vld [vmem:[%s3860_s1 + $0x180] sm:$0xff]  }
  0x34   : > { %2881 = vmatpush3.bf16.msra.mxu1 %v3177_v10  ;;  %v368_v10 = vrot.slane %v366_v53, 4  ;;  %2870 = vmatprep.mubr.bf16.mxu1 %v2388_v7  ;;  %v1159_v32 = vsel %vm3366_vm2, %v1154_v18, %v1158_v49  ;;  %v1184_v53 = vshll.u32 %v3515_v27, 16  ;;  %v2526_v7 = vld [vmem:[%s3321_s20 + $0x8] sm:$0xe]  ;;  %v2536_v36 = vrot.slane %v2528_v25, 9 }
  0x35   : > { %2975 = vmatpush3.bf16.msra.mxu0 %v3176_v9  ;;  %2882 = vmatprep.subr.bf16.mxu1 %v3179_v30  ;;  %v2496_v9 = vld [vmem:[%s3321_s20 + $0x40] sm:$0xf]  ;;  %v2516_v39 = vcombine.low %v1145_v23, %v1159_v32  ;;  %v386_v44 = vor.u32 %v385_v35, %v382_v1  ;;  %v2534_v14 = vrot.slane %v2526_v7, 9  ;;  %v1168_v18 = vrot.slane %v1167_v4, 4 }
  0x36   : > { %2976 = vmatprep.subr.bf16.mxu0 %v3178_v29  ;;  %v372_v33 = vor.u32 %v371_v19, %v368_v10  ;;  %v1178_v49 = vshll.u32 %v2496_v9, 16  ;;  %v2527_v10 = vld [vmem:[%s3321_s20 + $0x10] sm:$0xe]  ;;  %v2398_v19 = vcombine.low %v3327_v11, %v3330_v12  ;;  %v1186_v1 = vrot.slane %v1184_v53, 5  ;;  %v2529_v12 = vld [vmem:[%s3321_s20 + $0x20] sm:$0xe] }
  0x37   : > { %2966 = vmatprep.mubr.bf16.mxu0 %v2516_v39  ;;  %v387_v3 = vrot.slane %v386_v44, 4  ;;  %v1369_v32 = vsel %vm3540_vm5, %v2534_v14, %v1368_v57  ;;  %v1173_v21 = vsel %vm3366_vm2, %v1168_v18, %v1172_v34  ;;  %v3188_v35 = vld [vmem:[%s3860_s1 + $0x80] sm:$0xff]   ;;  %v1377_v42 = vsel %vm3540_vm5, %v2536_v36, %v1376_v48  ;;  %v3193_v44 = vld [vmem:[%s3860_s1 + $0x90] sm:$0xff]  }
  0x38   : > { %2883 = vmatpush3.bf16.msra.mxu1 %v3179_v30  ;;  %v3182_v30 = vld [vmem:[%s3860_s1 + $0x168] sm:$0xff]   ;;  %v373_v43 = vrot.slane %v372_v33, 4  ;;  %v1180_v16 = vrot.slane %v1178_v49, 5  ;;  %v1384_v45 = vrot.slane %v3465_v24, 5  ;;  %v1392_v53 = vrot.slane %v3507_v17, 5  ;;  %v3197_v18 = vld [vmem:[%s3860_s1 + $0xa0] sm:$0xff]  }
  0x39   : > { %2977 = vmatpush3.bf16.msra.mxu0 %v3178_v29  ;;  %2884 = vmatprep.subr.bf16.mxu1 %v3181_v6  ;;  %v1175_v29 = vshrl.u32 %v2496_v9, 16  ;;  %v1396_v24 = vrot.slane %v3515_v27, 5  ;;  %v709_v34 = vrot.slane %v3339_v15, 5  ;;  %v713_v17 = vrot.slane %v3384_v56, 5  ;;  %v677_v15 = vld [vmem:[%s3321_s20 + $0x8] sm:$0xe] }
  0x3a   : > { %2978 = vmatprep.subr.bf16.mxu0 %v3180_v54  ;;  %v378_v59 = vsel %vm3366_vm2, %v373_v43, %v377_v20  ;;  %v2535_v20 = vrot.slane %v2527_v10, 9  ;;  %v3191_v43 = vld [vmem:[%s3860_s1 + $0x88] sm:$0xff]   ;;  %v3194_v10 = vld [vmem:[%s3860_s1 + $0x190] sm:$0xff]   ;;  %v2411_v14 = vrot.slane %v677_v15, 9  ;;  %v721_v36 = vrot.slane %v3445_v0, 5  ;;  %v3207_v0 = vld [vmem:[%s3860_s1 + $0xc0] sm:$0xff]  }
  0x3b   : > { %v1177_v5 = vrot.slane %v1175_v29, 4  ;;  %v1388_v29 = vrot.slane %v3469_v26, 5  ;;  %v2401_v26 = vcombine.low %v3480_v46, %v3485_v50  ;;  %v3195_v46 = vld [vmem:[%s3860_s1 + $0x98] sm:$0xff]   ;;  %v3212_v15 = vld [vmem:[%s3860_s1 + $0x1c8] sm:$0xff]  }
  0x3c   : > { %2885 = vmatpush3.bf16.msra.mxu1 %v3181_v6  ;;  %v3185_v6 = vld [vmem:[%s3860_s1 + $0x38] sm:$0xff]   ;;  %v1373_v11 = vsel %vm3540_vm5, %v2535_v20, %v1372_v47 }
  0x3d   : > { %2979 = vmatpush3.bf16.msra.mxu0 %v3180_v54  ;;  %2886 = vmatprep.subr.bf16.mxu1 %v3183_v37  ;;  %v392_v54 = vsel %vm3366_vm2, %v387_v3, %v391_v40  ;;  %v1181_v23 = vor.u32 %v1180_v16, %v1177_v5  ;;  %v2558_v57 = vcombine.low %v1369_v32, %v1373_v11  ;;  %v676_v16 = vld [vmem:[%s3321_s20] sm:$0xe]  ;;  %v3196_v20 = vld [vmem:[%s3860_s1 + $0x198] sm:$0xff]  }
  0x3e   : > { %2980 = vmatprep.subr.bf16.mxu0 %v3182_v30  ;;  %v2389_v9 = vcombine.low %v378_v59, %v392_v54  ;;  %v2399_v40 = vcombine.low %v3376_v51, %v3381_v55  ;;  %v2400_v51 = vcombine.low %v3439_v62, %v3442_v63  ;;  %v705_v55 = vrot.slane %v3333_v13, 5  ;;  %v3192_v62 = vld [vmem:[%s3860_s1 + $0x188] sm:$0xff]   ;;  %v2531_v63 = vld [vmem:[%s3321_s20 + $0x30] sm:$0xe]  ;;  %v2533_v59 = vld [vmem:[%s3321_s20 + $0x40] sm:$0xe] }
  0x3f   : > { %v1182_v33 = vrot.slane %v1181_v23, 4  ;;  %v2530_v13 = vld [vmem:[%s3321_s20 + $0x28] sm:$0xe]  ;;  %v2539_v49 = vrot.slane %v2531_v63, 9  ;;  %v2541_v7 = vrot.slane %v2533_v59, 9  ;;  %v2410_v56 = vrot.slane %v676_v16, 9 }
  0x40   : > { %2887 = vmatpush3.bf16.msra.mxu1 %v3183_v37  ;;  %v2537_v37 = vrot.slane %v2529_v12, 9  ;;  %v2538_v48 = vrot.slane %v2530_v13, 9  ;;  %v717_v54 = vrot.slane %v3389_v60, 5  ;;  %v678_v23 = vld [vmem:[%s3321_s20 + $0x10] sm:$0xe] }
  0x41   : > { %2981 = vmatpush3.bf16.msra.mxu0 %v3182_v30  ;;  %2871 = vmatmul.mubr.bf16.gmra.mrb[4].mxu1 %v2389_v9  ;;  %v1187_v31 = vsel %vm3366_vm2, %v1182_v33, %v1186_v1  ;;  %v1389_v4 = vsel %vm3540_vm5, %v2539_v49, %v1388_v29  ;;  %v710_v9 = vsel %vm3540_vm5, %v2411_v14, %v709_v34  ;;  %v679_v60 = vld [vmem:[%s3321_s20 + $0x18] sm:$0xe]  ;;  %v2412_v25 = vrot.slane %v678_v23, 9  ;;  %v3199_v33 = vld [vmem:[%s3860_s1 + $0xa8] sm:$0xff]  }
  0x42   : > { %2982 = vmatprep.subr.bf16.mxu0 %v3184_v58  ;;  %2888 = vmatprep.subr.bf16.mxu1 %v3185_v6  ;;  %v2517_v39 = vcombine.low %v1173_v21, %v1187_v31  ;;  %v1381_v30 = vsel %vm3540_vm5, %v2537_v37, %v1380_v22  ;;  %v1385_v3 = vsel %vm3540_vm5, %v2538_v48, %v1384_v45  ;;  %v3208_v32 = vld [vmem:[%s3321_s20 + $0x10] ss:$8 sps:$4 sm:$0xff]   ;;  %v729_v29 = vrot.slane %v3488_v52, 5  ;;  %v3211_v49 = vld [vmem:[%s3860_s1 + $0xc8] sm:$0xff]  }
  0x43   : > { %2890 = vmatprep.mubr.bf16.mxu1 %v2398_v19  ;;  %v2559_v47 = vcombine.low %v1377_v42, %v1381_v30  ;;  %v2560_v27 = vcombine.low %v1385_v3, %v1389_v4  ;;  %v706_v19 = vsel %vm3540_vm5, %v2410_v56, %v705_v55  ;;  %v714_v11 = vsel %vm3540_vm5, %v2412_v25, %v713_v17  ;;  %v3202_v31 = vld [vmem:[%s3860_s1 + $0xb0] sm:$0xff]   ;;  %v3205_v37 = vld [vmem:[%s3860_s1 + $0xb8] sm:$0xff]   ;;  %v2612_v25 = vld [vmem:[%s3321_s20 + $0x28] sm:$0xf] }
  0x44   : > { %2889 = vmatpush3.bf16.msra.mxu1 %v3185_v6  ;;  %2967 = vmatmul.mubr.bf16.gmra.mrb[4].mxu0 %v2517_v39  ;;  %v1397_v6 = vsel %vm3540_vm5, %v2541_v7, %v1396_v24  ;;  %v2434_v1 = vcombine.low %v706_v19, %v710_v9  ;;  %v680_v39 = vld [vmem:[%s3321_s20 + $0x20] sm:$0xe]  ;;  %v3206_v45 = vld [vmem:[%s3860_s1 + $0x1b8] sm:$0xff]   ;;  %v3679_v24 = vld [vmem:[%s3321_s20 + $0x14] sm:$0x1] }
  0x45   : > { %2983 = vmatpush3.bf16.msra.mxu0 %v3184_v58  ;;  %2898 = vmatprep.subr.bf16.mxu1 %v3188_v35  ;;  %v2532_v58 = vld [vmem:[%s3321_s20 + $0x38] sm:$0xe]  ;;  %v2414_v42 = vrot.slane %v680_v39, 9  ;;  %v1749_v59 = vshll.u32 %v3679_v24, 16  ;;  %v3210_v7 = vld [vmem:[%s3321_s20 + $0x20] ss:$8 sps:$4 sm:$0xff]  }
  0x46   : > { %2984 = vmatprep.subr.bf16.mxu0 %v3186_v28  ;;  %2986 = vmatprep.mubr.bf16.mxu0 %v2558_v57  ;;  %v2540_v5 = vrot.slane %v2532_v58, 9  ;;  %v3200_v57 = vld [vmem:[%s3860_s1 + $0x1a8] sm:$0xff]   ;;  %v2608_v52 = vld [vmem:[%s3321_s20 + $0x18] sm:$0xf]  ;;  %v3214_v9 = vld [vmem:[%s3860_s1 + $0x1d0] sm:$0xff]  }
  0x47   : > { %v1754_v3 = vshrl.u32 %v2608_v52, 16  ;;  %v1757_v4 = vshll.u32 %v2608_v52, 16  ;;  %v3221_v56 = vld [vmem:[%s3321_s20 + $0x30] ss:$8 sps:$4 sm:$0xff]   ;;  %v3220_v52 = vld [vmem:[%s3860_s1 + $0x1e8] sm:$0xff]  }
  0x48   : > { %v1393_v50 = vsel %vm3540_vm5, %v2540_v5, %v1392_v53  ;;  %v2606_v53 = vld [vmem:[%s3321_s20 + $0x10] sm:$0xf]  ;;  %v3215_v23 = vld [vmem:[%s3860_s1 + $0xd8] sm:$0xff]  }
  0x49   : > { %2985 = vmatpush3.bf16.msra.mxu0 %v3186_v28  ;;  %2891 = vmatmul.mubr.bf16.vlgmr.msra.gmra.mrb[0].mxu1 %v2399_v40  ;;  %v2561_v22 = vcombine.low %v1393_v50, %v1397_v6  ;;  %v2413_v28 = vrot.slane %v679_v60, 9  ;;  %v681_v40 = vld [vmem:[%s3321_s20 + $0x28] sm:$0xe]  ;;  %v1743_v58 = vshll.u32 %v2606_v53, 16  ;;  %v1756_v50 = vrot.slane %v1754_v3, 4 }
  0x4a   : > { %2994 = vmatprep.subr.bf16.mxu0 %v3189_v41  ;;  %2899 = vmatpush3.bf16.msra.mxu1 %v3188_v35  ;;  %v3198_v35 = vld [vmem:[%s3860_s1 + $0x1a0] sm:$0xff]   ;;  %v2415_v30 = vrot.slane %v681_v40, 9  ;;  %v1759_v6 = vrot.slane %v1757_v4, 5 }
  0x4b   : > { %2900 = vmatprep.subr.bf16.mxu1 %v3191_v43  ;;  %2894 = vmatprep.mubr.bf16.mxu1 %v2400_v51  ;;  %v718_v12 = vsel %vm3540_vm5, %v2413_v28, %v717_v54  ;;  %v682_v51 = vld [vmem:[%s3321_s20 + $0x30] sm:$0xe]  ;;  %v1745_v16 = vrot.slane %v1743_v58, 5  ;;  %v1751_v54 = vrot.slane %v1749_v59, 5 }
  0x4c   : > { %2987 = vmatmul.mubr.bf16.vlgmr.msra.gmra.mrb[0].mxu0 %v2559_v47  ;;  %v2435_v21 = vcombine.low %v714_v11, %v718_v12  ;;  %v733_v47 = vrot.slane %v3497_v61, 5  ;;  %v2416_v63 = vrot.slane %v682_v51, 9  ;;  %v3683_v61 = vld [vmem:[%s3321_s20 + $0x1c] sm:$0x1]  ;;  %v3223_v11 = vld [vmem:[%s3321_s20 + $0x40] ss:$8 sps:$4 sm:$0xff]  }
  0x4d   : > { %2995 = vmatpush3.bf16.msra.mxu0 %v3189_v41  ;;  %2990 = vmatprep.mubr.bf16.mxu0 %v2560_v27  ;;  %v725_v41 = vrot.slane %v3448_v2, 5  ;;  %v722_v2 = vsel %vm3540_vm5, %v2414_v42, %v721_v36  ;;  %v1763_v5 = vshll.u32 %v3683_v61, 16  ;;  %v2614_v12 = vld [vmem:[%s3321_s20 + $0x30] sm:$0xf]  ;;  %v1785_v36 = vshll.u32 %v2612_v25, 16 }
  0x4e   : > { %2901 = vmatpush3.bf16.msra.mxu1 %v3191_v43  ;;  %2996 = vmatprep.subr.bf16.mxu0 %v3192_v62  ;;  %v3203_v43 = vld [vmem:[%s3860_s1 + $0x1b0] sm:$0xff]   ;;  %v730_v34 = vsel %vm3540_vm5, %v2416_v63, %v729_v29  ;;  %v1796_v40 = vshrl.u32 %v2614_v12, 16  ;;  %v3728_v51 = vld [vmem:[%s3321_s20 + $0x24] sm:$0x1] }
  0x4f   : > { %2902 = vmatprep.subr.bf16.mxu1 %v3193_v44  ;;  %v726_v55 = vsel %vm3540_vm5, %v2415_v30, %v725_v41  ;;  %v1765_v19 = vrot.slane %v1763_v5, 5  ;;  %v1799_v41 = vshll.u32 %v2614_v12, 16  ;;  %v1787_v29 = vrot.slane %v1785_v36, 5  ;;  %v2620_v5 = vld [vmem:[%s3321_s20 + $0x48] sm:$0xf]  ;;  %v3226_v12 = vld [vmem:[%s3860_s1 + $0x1f8] sm:$0xff]  }
  0x50   : > { %v2436_v13 = vcombine.low %v722_v2, %v726_v55  ;;  %v3731_v2 = vld [vmem:[%s3321_s20 + $0x2c] sm:$0x1]  ;;  %v1777_v58 = vshll.u32 %v3728_v51, 16 }
  0x51   : > { %2895 = vmatmul.mubr.bf16.gmra.mrb[4].mxu1 %v2401_v26  ;;  %2997 = vmatpush3.bf16.msra.mxu0 %v3192_v62  ;;  %v3209_v62 = vld [vmem:[%s3860_s1 + $0x1c0] sm:$0xff]   ;;  %v1740_v26 = vshrl.u32 %v2606_v53, 16  ;;  %v1801_v63 = vrot.slane %v1799_v41, 5  ;;  %v1791_v59 = vshll.u32 %v3731_v2, 16 }
  0x52   : > { %2903 = vmatpush3.bf16.msra.mxu1 %v3193_v44  ;;  %2998 = vmatprep.subr.bf16.mxu0 %v3194_v10  ;;  %v683_v44 = vld [vmem:[%s3321_s20 + $0x38] sm:$0xe]  ;;  %v2618_v53 = vld [vmem:[%s3321_s20 + $0x40] sm:$0xf] }
  0x53   : > { %2904 = vmatprep.subr.bf16.mxu1 %v3195_v46  ;;  %2914 = vmatprep.mubr.bf16.mxu1 %v2434_v1  ;;  %v2417_v48 = vrot.slane %v683_v44, 9  ;;  %v1742_v27 = vrot.slane %v1740_v26, 4  ;;  %v2610_v1 = vld [vmem:[%s3321_s20 + $0x20] sm:$0xf]  ;;  %v3222_v26 = vld [vmem:[%s3860_s1 + $0xf0] sm:$0xff]  }
  0x54   : > { %2991 = vmatmul.mubr.bf16.gmra.mrb[4].mxu0 %v2561_v22 }
  0x55   : > { %2999 = vmatpush3.bf16.msra.mxu0 %v3194_v10  ;;  %3010 = vmatprep.mubr.bf16.mxu0 %v3208_v32  ;;  %v734_v17 = vsel %vm3540_vm5, %v2417_v48, %v733_v47  ;;  %v1746_v10 = vor.u32 %v1745_v16, %v1742_v27  ;;  %v3734_v47 = vld [vmem:[%s3321_s20 + $0x34] sm:$0x1]  ;;  %v1827_v27 = vshll.u32 %v2618_v53, 16 }
  0x56   : > { %2905 = vmatpush3.bf16.msra.mxu1 %v3195_v46  ;;  %3000 = vmatprep.subr.bf16.mxu0 %v3196_v20  ;;  %v3213_v46 = vld [vmem:[%s3860_s1 + $0xd0] sm:$0xff]   ;;  %v2437_v14 = vcombine.low %v730_v34, %v734_v17  ;;  %v1805_v3 = vshll.u32 %v3734_v47, 16  ;;  %v1824_v17 = vshrl.u32 %v2618_v53, 16  ;;  %v2651_v53 = vld [vmem:[%s3321_s20 + $0x18] sm:$0xe] }
  0x57   : > { %2906 = vmatprep.subr.bf16.mxu1 %v3197_v18  ;;  %v1747_v22 = vrot.slane %v1746_v10, 4 }
  0x59   : > { %3001 = vmatpush3.bf16.msra.mxu0 %v3196_v20  ;;  %v3227_v20 = vld [vmem:[%s3321_s20 + $0x8] ss:$8 sps:$4 sm:$0xff]   ;;  %v1752_v28 = vsel %vm3366_vm2, %v1747_v22, %v1751_v54 }
  0x5a   : > { %2907 = vmatpush3.bf16.msra.mxu1 %v3197_v18  ;;  %3002 = vmatprep.subr.bf16.mxu0 %v3198_v35  ;;  %v1760_v18 = vor.u32 %v1759_v6, %v1756_v50  ;;  %v1838_v50 = vshrl.u32 %v2620_v5, 16  ;;  %v1841_v6 = vshll.u32 %v2620_v5, 16  ;;  %v2659_v5 = vrot.slane %v2651_v53, 9 }
  0x5b   : > { %2908 = vmatprep.subr.bf16.mxu1 %v3199_v33 }
  0x5c   : > { %v1761_v60 = vrot.slane %v1760_v18, 4  ;;  %v1793_v18 = vrot.slane %v1791_v59, 5  ;;  %v3232_v59 = vld [vmem:[%s3321_s20 + $0x38] ss:$8 sps:$4 sm:$0xff]  }
  0x5d   : > { %3003 = vmatpush3.bf16.msra.mxu0 %v3198_v35  ;;  %v1768_v35 = vshrl.u32 %v2610_v1, 16 }
  0x5e   : > { %2909 = vmatpush3.bf16.msra.mxu1 %v3199_v33  ;;  %3004 = vmatprep.subr.bf16.mxu0 %v3200_v57  ;;  %v1766_v32 = vsel %vm3366_vm2, %v1761_v60, %v1765_v19  ;;  %v3217_v33 = vld [vmem:[%s3860_s1 + $0xe0] sm:$0xff]   ;;  %v3761_v60 = vld [vmem:[%s3321_s20 + $0x4c] sm:$0x1] }
  0x5f   : > { %2910 = vmatprep.subr.bf16.mxu1 %v3202_v31  ;;  %v2638_v39 = vcombine.low %v1752_v28, %v1766_v32  ;;  %v1770_v55 = vrot.slane %v1768_v35, 4  ;;  %v1840_v28 = vrot.slane %v1838_v50, 4  ;;  %v1843_v32 = vrot.slane %v1841_v6, 5  ;;  %v3228_v35 = vld [vmem:[%s3321_s20 + $0x18] ss:$8 sps:$4 sm:$0xff]   ;;  %v3236_v6 = vld [vmem:[%s3860_s1 + $0x228] sm:$0xff]  }
  0x61   : > { %3005 = vmatpush3.bf16.msra.mxu0 %v3200_v57  ;;  %v1782_v57 = vshrl.u32 %v2612_v25, 16  ;;  %v1829_v25 = vrot.slane %v1827_v27, 5 }
  0x62   : > { %2911 = vmatpush3.bf16.msra.mxu1 %v3202_v31  ;;  %3006 = vmatprep.subr.bf16.mxu0 %v3203_v43  ;;  %v1771_v31 = vshll.u32 %v2610_v1, 16  ;;  %v1826_v1 = vrot.slane %v1824_v17, 4 }
  0x63   : > { %2912 = vmatprep.subr.bf16.mxu1 %v3205_v37 }
  0x64   : > { %v1773_v44 = vrot.slane %v1771_v31, 5 }
  0x65   : > { %3007 = vmatpush3.bf16.msra.mxu0 %v3203_v43  ;;  %v3218_v43 = vld [vmem:[%s3860_s1 + $0x1e0] sm:$0xff]  }
  0x66   : > { %2913 = vmatpush3.bf16.msra.mxu1 %v3205_v37  ;;  %3008 = vmatprep.subr.bf16.mxu0 %v3206_v45  ;;  %v3216_v37 = vld [vmem:[%s3860_s1 + $0x1d8] sm:$0xff]  }
  0x67   : > { %2922 = vmatprep.subr.bf16.mxu1 %v3207_v0 }
  0x69   : > { %2915 = vmatmul.mubr.bf16.vlgmr.msra.gmra.mrb[0].mxu1 %v2435_v21  ;;  %3009 = vmatpush3.bf16.msra.mxu0 %v3206_v45  ;;  %v2616_v21 = vld [vmem:[%s3321_s20 + $0x38] sm:$0xf]  ;;  %v1784_v45 = vrot.slane %v1782_v57, 4 }
  0x6a   : > { %2923 = vmatpush3.bf16.msra.mxu1 %v3207_v0  ;;  %2918 = vmatprep.mubr.bf16.mxu1 %v2436_v13  ;;  %v1810_v42 = vshrl.u32 %v2616_v21, 16  ;;  %v1813_v30 = vshll.u32 %v2616_v21, 16  ;;  %v3219_v0 = vld [vmem:[%s3860_s1 + $0xe8] sm:$0xff]   ;;  %v1798_v13 = vrot.slane %v1796_v40, 4  ;;  %v2654_v21 = vld [vmem:[%s3321_s20 + $0x30] sm:$0xe] }
  0x6b   : > { %2924 = vmatprep.subr.bf16.mxu1 %v3211_v49  ;;  %3018 = vmatprep.subr.bf16.mxu0 %v3209_v62  ;;  %v1788_v34 = vor.u32 %v1787_v29, %v1784_v45 }
  0x6c   : > { %3011 = vmatmul.mubr.bf16.vlgmr.msra.gmra.mrb[0].mxu0 %v3210_v7  ;;  %v1812_v48 = vrot.slane %v1810_v42, 4  ;;  %v1774_v7 = vor.u32 %v1773_v44, %v1770_v55  ;;  %v1802_v16 = vor.u32 %v1801_v63, %v1798_v13  ;;  %v1830_v42 = vor.u32 %v1829_v25, %v1826_v1 }
  0x6d   : > { %3019 = vmatpush3.bf16.msra.mxu0 %v3209_v62  ;;  %3014 = vmatprep.mubr.bf16.mxu0 %v3221_v56  ;;  %v3737_v62 = vld [vmem:[%s3321_s20 + $0x3c] sm:$0x1]  ;;  %v3224_v56 = vld [vmem:[%s3860_s1 + $0x1f0] sm:$0xff]   ;;  %v1789_v54 = vrot.slane %v1788_v34, 4  ;;  %v2047_v55 = vrot.slane %v3734_v47, 5  ;;  %v2039_v25 = vrot.slane %v3728_v51, 5 }
  0x6e   : > { %2925 = vmatpush3.bf16.msra.mxu1 %v3211_v49  ;;  %3020 = vmatprep.subr.bf16.mxu0 %v3212_v15  ;;  %v1815_v49 = vrot.slane %v1813_v30, 5  ;;  %v1819_v4 = vshll.u32 %v3737_v62, 16  ;;  %v1775_v10 = vrot.slane %v1774_v7, 4  ;;  %v1803_v19 = vrot.slane %v1802_v16, 4  ;;  %v3234_v16 = vld [vmem:[%s3860_s1 + $0x218] sm:$0xff]  }
  0x6f   : > { %2926 = vmatprep.subr.bf16.mxu1 %v3213_v46  ;;  %v1794_v57 = vsel %vm3366_vm2, %v1789_v54, %v1793_v18  ;;  %v1844_v30 = vor.u32 %v1843_v32, %v1840_v28  ;;  %v2051_v45 = vrot.slane %v3737_v62, 5  ;;  %v2035_v7 = vrot.slane %v3683_v61, 5 }
  0x70   : > { %v2059_v54 = vrot.slane %v3761_v60, 5  ;;  %v2043_v32 = vrot.slane %v3731_v2, 5 }
  0x71   : > { %2919 = vmatmul.mubr.bf16.gmra.mrb[4].mxu1 %v2437_v14  ;;  %3021 = vmatpush3.bf16.msra.mxu0 %v3212_v15  ;;  %v3225_v15 = vld [vmem:[%s3860_s1 + $0xf8] sm:$0xff]   ;;  %v1779_v14 = vrot.slane %v1777_v58, 5  ;;  %v3233_v58 = vld [vmem:[%s3860_s1 + $0x210] sm:$0xff]   ;;  %v2036_v61 = vsel %vm3540_vm5, %v2659_v5, %v2035_v7 }
  0x72   : > { %2927 = vmatpush3.bf16.msra.mxu1 %v3213_v46  ;;  %2938 = vmatprep.mubr.bf16.mxu1 %v3227_v20  ;;  %v1816_v46 = vor.u32 %v1815_v49, %v1812_v48  ;;  %v1807_v20 = vrot.slane %v1805_v3, 5  ;;  %v2650_v49 = vld [vmem:[%s3321_s20 + $0x10] sm:$0xe] }
  0x73   : > { %2928 = vmatprep.subr.bf16.mxu1 %v3215_v23  ;;  %3022 = vmatprep.subr.bf16.mxu0 %v3214_v9  ;;  %v1780_v31 = vsel %vm3366_vm2, %v1775_v10, %v1779_v14  ;;  %v2658_v3 = vrot.slane %v2650_v49, 9  ;;  %v2657_v10 = vld [vmem:[%s3321_s20 + $0x48] sm:$0xe]  ;;  %v2695_v49 = vld [vmem:[%s3862_s3] ss:$0 sm:$0xff] }
  0x74   : > { %3015 = vmatmul.mubr.bf16.gmra.mrb[4].mxu0 %v3223_v11  ;;  %v1817_v22 = vrot.slane %v1816_v46, 4  ;;  %v3229_v11 = vld [vmem:[%s3860_s1 + $0x200] sm:$0xff]   ;;  %v1808_v40 = vsel %vm3366_vm2, %v1803_v19, %v1807_v20  ;;  %v2639_v29 = vcombine.low %v1780_v31, %v1794_v57  ;;  %v2665_v19 = vrot.slane %v2657_v10, 9  ;;  %v3238_v20 = vld [vmem:[%s3860_s1 + $0x238] sm:$0xff]  }
  0x75   : > { %3023 = vmatpush3.bf16.msra.mxu0 %v3214_v9  ;;  %3034 = vmatprep.mubr.bf16.mxu0 %v2638_v39  ;;  %v1821_v9 = vrot.slane %v1819_v4, 5  ;;  %v3231_v39 = vld [vmem:[%s3321_s20 + $0x28] ss:$8 sps:$4 sm:$0xff]   ;;  %v2031_v4 = vrot.slane %v3679_v24, 5 }
  0x76   : > { %2929 = vmatpush3.bf16.msra.mxu1 %v3215_v23  ;;  %3024 = vmatprep.subr.bf16.mxu0 %v3216_v37  ;;  %v3758_v23 = vld [vmem:[%s3321_s20 + $0x44] sm:$0x1] }
  0x77   : > { %2930 = vmatprep.subr.bf16.mxu1 %v3217_v33  ;;  %v1833_v36 = vshll.u32 %v3758_v23, 16  ;;  %v1822_v41 = vsel %vm3366_vm2, %v1817_v22, %v1821_v9  ;;  %v2032_v24 = vsel %vm3540_vm5, %v2658_v3, %v2031_v4  ;;  %v2055_v14 = vrot.slane %v3758_v23, 5  ;;  %v2652_v22 = vld [vmem:[%s3321_s20 + $0x20] sm:$0xe]  ;;  %v2653_v9 = vld [vmem:[%s3321_s20 + $0x28] sm:$0xe] }
  0x78   : > { %v2640_v13 = vcombine.low %v1808_v40, %v1822_v41  ;;  %v2682_v50 = vcombine.low %v2032_v24, %v2036_v61  ;;  %v2060_v23 = vsel %vm3540_vm5, %v2665_v19, %v2059_v54  ;;  %v2661_v28 = vrot.slane %v2653_v9, 9 }
  0x79   : > { %3025 = vmatpush3.bf16.msra.mxu0 %v3216_v37  ;;  %v1847_v37 = vshll.u32 %v3761_v60, 16  ;;  %v1835_v63 = vrot.slane %v1833_v36, 5  ;;  %v2660_v60 = vrot.slane %v2652_v22, 9 }
  0x7a   : > { %2931 = vmatpush3.bf16.msra.mxu1 %v3217_v33  ;;  %3026 = vmatprep.subr.bf16.mxu0 %v3218_v43  ;;  %v2655_v33 = vld [vmem:[%s3321_s20 + $0x38] sm:$0xe] }
  0x7b   : > { %2932 = vmatprep.subr.bf16.mxu1 %v3219_v0  ;;  %v2663_v44 = vrot.slane %v2655_v33, 9  ;;  %v1849_v48 = vrot.slane %v1847_v37, 5 }
  0x7d   : > { %3027 = vmatpush3.bf16.msra.mxu0 %v3218_v43  ;;  %v3230_v43 = vld [vmem:[%s3860_s1 + $0x208] sm:$0xff]   ;;  %v2052_v62 = vsel %vm3540_vm5, %v2663_v44, %v2051_v45  ;;  %v2694_v44 = vld [vmem:[%s3861_s2] ss:$0 sm:$0xff] }
  0x7e   : > { %2933 = vmatpush3.bf16.msra.mxu1 %v3219_v0  ;;  %3028 = vmatprep.subr.bf16.mxu0 %v3220_v52  ;;  %v2662_v0 = vrot.slane %v2654_v21, 9  ;;  %v2044_v21 = vsel %vm3540_vm5, %v2661_v28, %v2043_v32 }
  0x7f   : > { %2934 = vmatprep.subr.bf16.mxu1 %v3222_v26 }
  0x80   : > { %v2048_v47 = vsel %vm3540_vm5, %v2662_v0, %v2047_v55 }
  0x81   : > { %3029 = vmatpush3.bf16.msra.mxu0 %v3220_v52  ;;  %v1831_v52 = vrot.slane %v1830_v42, 4  ;;  %v2684_v34 = vcombine.low %v2048_v47, %v2052_v62 }
  0x82   : > { %2935 = vmatpush3.bf16.msra.mxu1 %v3222_v26  ;;  %3030 = vmatprep.subr.bf16.mxu0 %v3224_v56  ;;  %v1845_v26 = vrot.slane %v1844_v30, 4 }
  0x83   : > { %2936 = vmatprep.subr.bf16.mxu1 %v3225_v15  ;;  %v1836_v17 = vsel %vm3366_vm2, %v1831_v52, %v1835_v63 }
  0x84   : > { %v1850_v27 = vsel %vm3366_vm2, %v1845_v26, %v1849_v48 }
  0x85   : > { %3031 = vmatpush3.bf16.msra.mxu0 %v3224_v56  ;;  %v2641_v46 = vcombine.low %v1836_v17, %v1850_v27  ;;  %v2656_v56 = vld [vmem:[%s3321_s20 + $0x40] sm:$0xe]  ;;  %s2698_s20 = sshll.u32 %s3870_s19, 5 }
  0x86   : > { %2937 = vmatpush3.bf16.msra.mxu1 %v3225_v15  ;;  %3032 = vmatprep.subr.bf16.mxu0 %v3226_v12  ;;  %v3237_v15 = vld [vmem:[%s3860_s1 + $0x230] sm:$0xff]   ;;  %v2664_v18 = vrot.slane %v2656_v56, 9  ;;  %s239_s12 = scalar_lea.vmem %s3863_s4, %s2698_s20  ;;  %s244_s22 = scalar_lea.vmem %s3864_s5, %s2698_s20 }
  0x87   : > { %3066 = vmatprep.subr.bf16.mxu1 %v3229_v11  ;;  %v2737_v48 = vld [vmem:[%s239_s12 + $0x10] sm:$0xff]   ;;  %v2736_v53 = vld [vmem:[%s239_s12 + $0x8] sm:$0xff]   ;;  %v2701_v3 = vld [vmem:[%s239_s12] sm:$0xff]  }
  0x88   : > { %v2056_v1 = vsel %vm3540_vm5, %v2664_v18, %v2055_v14  ;;  %v2710_v5 = vunpack.c.l.bf16 %v2737_v48  ;;  %v2706_v17 = vunpack.c.l.bf16 %v2736_v53  ;;  %v2702_v10 = vunpack.c.l.bf16 %v2701_v3 }
  0x89   : > { %2939 = vmatmul.mubr.bf16.vlgmr.msra.gmra.mrb[0].mxu1 %v3228_v35  ;;  %3033 = vmatpush3.bf16.msra.mxu0 %v3226_v12  ;;  %v2040_v12 = vsel %vm3540_vm5, %v2660_v60, %v2039_v25 }
  0x8a   : > { %3074 = vmatpush3.bf16.msra.mxu1 %v3229_v11  ;;  %2942 = vmatprep.mubr.bf16.mxu1 %v3231_v39  ;;  %v2683_v33 = vcombine.low %v2040_v12, %v2044_v21 }
  0x8b   : > { %3067 = vmatprep.subr.bf16.mxu1 %v3230_v43  ;;  %3042 = vmatprep.subr.bf16.mxu0 %v3229_v11 }
  0x8c   : > { %3035 = vmatmul.mubr.bf16.vlgmr.msra.gmra.mrb[0].mxu0 %v2639_v29  ;;  %v2738_v29 = vld [vmem:[%s239_s12 + $0x18] sm:$0xff]  }
  0x8d   : > { %3043 = vmatpush3.bf16.msra.mxu0 %v3229_v11  ;;  %3038 = vmatprep.mubr.bf16.mxu0 %v2640_v13  ;;  %v2685_v11 = vcombine.low %v2056_v1, %v2060_v23  ;;  %v2714_v62 = vunpack.c.l.bf16 %v2738_v29  ;;  %v2715_v24 = vunpack.c.h.bf16 %v2738_v29  ;;  %v2707_v23 = vunpack.c.h.bf16 %v2736_v53 }
  0x8e   : > { %3075 = vmatpush3.bf16.msra.mxu1 %v3230_v43  ;;  %3044 = vmatprep.subr.bf16.mxu0 %v3230_v43 }
  0x8f   : > { %3068 = vmatprep.subr.bf16.mxu1 %v3233_v58 }
  0x91   : > { %2943 = vmatmul.mubr.bf16.gmra.mrb[4].mxu1 %v3232_v59  ;;  %3045 = vmatpush3.bf16.msra.mxu0 %v3230_v43 }
  0x92   : > { %3076 = vmatpush3.bf16.msra.mxu1 %v3233_v58  ;;  %3062 = vmatprep.mubr.bf16.mxu1 %v2684_v34 }
  0x93   : > { %3069 = vmatprep.subr.bf16.mxu1 %v3234_v16  ;;  %3046 = vmatprep.subr.bf16.mxu0 %v3233_v58 }
  0x94   : > { %3039 = vmatmul.mubr.bf16.gmra.mrb[4].mxu0 %v2641_v46 }
  0x95   : > { %3047 = vmatpush3.bf16.msra.mxu0 %v3233_v58  ;;  %3058 = vmatprep.mubr.bf16.mxu0 %v2682_v50 }
  0x96   : > { %3077 = vmatpush3.bf16.msra.mxu1 %v3234_v16  ;;  %3048 = vmatprep.subr.bf16.mxu0 %v3234_v16 }
  0x97   : > { %3070 = vmatprep.subr.bf16.mxu1 %v3235_v38 }
  0x99   : > { %3049 = vmatpush3.bf16.msra.mxu0 %v3234_v16 }
  0x9a   : > { %3078 = vmatpush3.bf16.msra.mxu1 %v3235_v38  ;;  %3050 = vmatprep.subr.bf16.mxu0 %v3235_v38 }
  0x9b   : > { %3071 = vmatprep.subr.bf16.mxu1 %v3236_v6 }
  0x9d   : > { %3051 = vmatpush3.bf16.msra.mxu0 %v3235_v38 }
  0x9e   : > { %3079 = vmatpush3.bf16.msra.mxu1 %v3236_v6  ;;  %3052 = vmatprep.subr.bf16.mxu0 %v3236_v6 }
  0x9f   : > { %3072 = vmatprep.subr.bf16.mxu1 %v3237_v15 }
  0xa1   : > { %3053 = vmatpush3.bf16.msra.mxu0 %v3236_v6  ;;  %v2711_v6 = vunpack.c.h.bf16 %v2737_v48 }
  0xa2   : > { %3080 = vmatpush3.bf16.msra.mxu1 %v3237_v15  ;;  %3054 = vmatprep.subr.bf16.mxu0 %v3237_v15 }
  0xa3   : > { %3073 = vmatprep.subr.bf16.mxu1 %v3238_v20 }
  0xa5   : > { %3055 = vmatpush3.bf16.msra.mxu0 %v3237_v15 }
  0xa6   : > { %3081 = vmatpush3.bf16.msra.mxu1 %v3238_v20  ;;  %3056 = vmatprep.subr.bf16.mxu0 %v3238_v20 }
  0xa9   : > { %3063 = vmatmul.mubr.bf16.vlgmr.msra.gmra.mrb[8].mxu1 %v2685_v11  ;;  %3057 = vmatpush3.bf16.msra.mxu0 %v3238_v20  ;;  %v2703_v11 = vunpack.c.h.bf16 %v2701_v3 }
  0xac   : > { %3059 = vmatmul.mubr.bf16.vlgmr.msra.gmra.mrb[0].mxu0 %v2683_v33 }
 0x15c   : > { %v2940_v35 = vpop.f32.mrb[0].mxu1 }
 0x15d   : > { %v1021_v51 = vpop.f32.mrb[1].mxu1 }
 0x15e   : > { %v2941_v2 = vpop.f32.mrb[2].mxu1 }
 0x15f   : > { %v1024_v31 = vpop.f32.mrb[3].mxu1 }
 0x164   : > { %v2944_v57 = vpop.f32.mrb[4].mxu1 }
 0x165   : > { %v1037_v36 = vpop.f32.mrb[5].mxu1 }
 0x166   : > { %v2945_v37 = vpop.f32.mrb[6].mxu1 }
 0x167   : > { %v1040_v39 = vpop.f32.mrb[7].mxu1  ;;  %v3040_v40 = vpop.f32.mrb[4].mxu0 }
 0x168   : > { %v3086_v41 = vadd.f32 %v3040_v40, %v2944_v57  ;;  %v1982_v42 = vpop.f32.mrb[5].mxu0 }
 0x169   : > { %v3088_v8 = vadd.f32 %v1982_v42, %v1037_v36  ;;  %v3041_v30 = vpop.f32.mrb[6].mxu0 }
 0x16a   : > { %v3090_v43 = vadd.f32 %v3041_v30, %v2945_v37  ;;  %v1985_v0 = vpop.f32.mrb[7].mxu0 }
 0x16b   : > { %v3092_v55 = vadd.f32 %v1985_v0, %v1040_v39 }
 0x17c   : > { %v3064_v45 = vpop.f32.mrb[8].mxu1 }
 0x17d   : > { %v3087_v13 = vadd.f32 %v3086_v41, %v3064_v45  ;;  %v2192_v63 = vpop.f32.mrb[9].mxu1 }
 0x17e   : > { %v3089_v52 = vadd.f32 %v3088_v8, %v2192_v63  ;;  %v3065_v26 = vpop.f32.mrb[10].mxu1 }
 0x17f   : > { %v2228_v47 = vmul.f32 %v3087_v13, %v2694_v44  ;;  %v3091_v58 = vadd.f32 %v3090_v43, %v3065_v26  ;;  %v2195_v59 = vpop.f32.mrb[11].mxu1  ;;  %v3060_v34 = vpop.f32.mrb[0].mxu0 }
 0x180   : > { %v2226_v4 = vmul.f32 %v3089_v52, %v2694_v44  ;;  %v3093_v7 = vadd.f32 %v3092_v55, %v2195_v59  ;;  %v3082_v61 = vadd.f32 %v3060_v34, %v2940_v35  ;;  %v2176_v46 = vpop.f32.mrb[1].mxu0 }
 0x181   : > { %v2243_v27 = vadd.f32 %v2695_v49, %v2228_v47  ;;  %v2229_v16 = vmul.f32 %v3091_v58, %v2694_v44  ;;  %v3083_v56 = vadd.f32 %v2176_v46, %v1021_v51  ;;  %v3061_v14 = vpop.f32.mrb[2].mxu0 }
 0x182   : > { %v2241_v38 = vadd.f32 %v2695_v49, %v2226_v4  ;;  %v2227_v50 = vmul.f32 %v3093_v7, %v2694_v44  ;;  %v2224_v18 = vmul.f32 %v3082_v61, %v2694_v44  ;;  %v3084_v20 = vadd.f32 %v3061_v14, %v2941_v2  ;;  %v2179_v22 = vpop.f32.mrb[3].mxu0 }
 0x183   : > { %v2267_v15 = vadd.f32 %v2714_v62, %v2243_v27  ;;  %v2244_v54 = vadd.f32 %v2695_v49, %v2229_v16  ;;  %v2222_v1 = vmul.f32 %v3083_v56, %v2694_v44  ;;  %v3085_v25 = vadd.f32 %v2179_v22, %v1024_v31 }
 0x184   : > { %v2265_v19 = vadd.f32 %v2710_v5, %v2241_v38  ;;  %v2242_v9 = vadd.f32 %v2695_v49, %v2227_v50  ;;  %v2239_v28 = vadd.f32 %v2695_v49, %v2224_v18  ;;  %v2225_v32 = vmul.f32 %v3084_v20, %v2694_v44 }
 0x185   : > { %v2268_v60 = vadd.f32 %v2715_v24, %v2244_v54  ;;  %v2275_v21 = vmax.f32 %v2267_v15, 0.0  ;;  %v2237_v33 = vadd.f32 %v2695_v49, %v2222_v1  ;;  %v2223_v51 = vmul.f32 %v3085_v25, %v2694_v44 }
 0x186   : > { %v2266_v12 = vadd.f32 %v2711_v6, %v2242_v9  ;;  %v2263_v57 = vadd.f32 %v2706_v17, %v2239_v28  ;;  %v2273_v36 = vmax.f32 %v2265_v19, 0.0  ;;  %v2240_v2 = vadd.f32 %v2695_v49, %v2225_v32 }
 0x187   : > { %v2276_v35 = vmax.f32 %v2268_v60, 0.0  ;;  %v2261_v39 = vadd.f32 %v2702_v10, %v2237_v33  ;;  %v2238_v31 = vadd.f32 %v2695_v49, %v2223_v51 }
 0x188   : > { %v2274_v37 = vmax.f32 %v2266_v12, 0.0  ;;  %v2264_v41 = vadd.f32 %v2707_v23, %v2240_v2  ;;  %v2271_v30 = vmax.f32 %v2263_v57, 0.0 }
 0x189   : > { %v2734_v40 = vpack.c.bf16 %v2276_v35, %v2275_v21  ;;  %v2262_v8 = vadd.f32 %v2703_v11, %v2238_v31  ;;  %v2269_v0 = vmax.f32 %v2261_v39, 0.0 }
 0x18a   : > { %v2729_v42 = vpack.c.bf16 %v2274_v37, %v2273_v36  ;;  %v2272_v43 = vmax.f32 %v2264_v41, 0.0 }
 0x18b   : > { %2741 = vst [vmem:[%s244_s22 + $0x18] sm:$0xff] %v2734_v40   ;;  %v2270_v55 = vmax.f32 %v2262_v8, 0.0 }
 0x18c   : > { %2740 = vst [vmem:[%s244_s22 + $0x10] sm:$0xff] %v2729_v42   ;;  %v2724_v44 = vpack.c.bf16 %v2272_v43, %v2271_v30 }
 0x18d   : > { %v2719_v45 = vpack.c.bf16 %v2270_v55, %v2269_v0 }
 0x18e   : > { %2739 = vst [vmem:[%s244_s22 + $0x8] sm:$0xff] %v2724_v44  }
 0x18f   : > { %2720 = vst [vmem:[%s244_s22] sm:$0xff] %v2719_v45  }
 0x190 PF: > { %s15_s18 = sadd.s32 1, %s3245_s18  }
 0x191   : > { %p12_p4 = scmp.ge.s32.totalorder %s15_s18, 4  }
 0x193   :  { %14 = sbr.rel (!%p12_p4) target bundleno = 1 (0x1), region = 83 }

</bundles_post_ra>
